<compile_context>
chip_gen: v7x
topology: tpu7x:2x2x1
jax: 0.10.0
libtpu: 0.0.40
codegen_flags: <defaults>
</compile_context>

<pallas_src>
import functools

import jax
import jax.numpy as jnp
import numpy as np
from jax.experimental import pallas as pl
from jax.experimental.pallas import tpu as pltpu


# ----------------------------------------------------------------------------
# Fused forward kernel (one image per grid step)
# ----------------------------------------------------------------------------
def _lenet_fused_kernel(
    x_ref,              # (1, 28, 28)      input image
    t1_ref,             # (5, 28, 144)     conv1 Toeplitz slabs   (per dy)
    b1_ref,             # (1, 144)         conv1 bias, lane n = o*24+x
    c1e_ref, c1o_ref,   # (144, 72)        pool1 lane (x) selection, even/odd
    r1e_ref, r1o_ref,   # (12, 24)         pool1 row  (y) selection, even/odd
    t2_ref,             # (30, 12, 96)     conv2 Toeplitz slabs   (per c,dy)
    b2_ref,             # (1, 96)          conv2 bias, lane n = o*8+x
    c2e_ref, c2o_ref,   # (96, 48)         pool2 lane selection
    r2e_ref, r2o_ref,   # (4, 8)           pool2 row selection
    selb_ref,           # (48, 192)        flatten: lane gather to NCHW order
    sela_ref,           # (4, 192)         flatten: row one-hot mask
    fc1w_ref, fc1b_ref,  # (192, H1), (1, H1)
    fc2w_ref, fc2b_ref,  # (H1, H2),  (1, H2)
    ow_ref, ob_ref,      # (H2, OUT), (1, OUT)
    out_ref,             # (1, 1, OUT)
    p1_scratch,          # VMEM (12, 72) f32 scratch (pooled conv1 activations)
):
    f32 = jnp.float32
    dot = functools.partial(jnp.dot, preferred_element_type=f32)

    # ---- conv1 + bias + ReLU: (28,28) -> (24, 144)  [rows y, lanes o*24+x]
    acc1 = jnp.zeros((24, 144), f32)
    for dy in range(5):
        acc1 = acc1 + dot(x_ref[0, dy:dy + 24, :], t1_ref[dy])
    a1 = jnp.maximum(acc1 + b1_ref[...], 0.0)

    # ---- pool1 (2x2, stride 2): -> (12, 72)  [rows i, lanes c*12+j]
    m1 = jnp.maximum(dot(a1, c1e_ref[...]), dot(a1, c1o_ref[...]))   # (24,72)
    p1 = jnp.maximum(dot(r1e_ref[...], m1), dot(r1o_ref[...], m1))   # (12,72)
    p1_scratch[...] = p1

    # ---- conv2 + bias + ReLU: -> (8, 96)  [rows y, lanes o*8+x]
    acc2 = jnp.zeros((8, 96), f32)
    for c in range(6):
        for dy in range(5):
            s = p1_scratch[dy:dy + 8, c * 12:(c + 1) * 12]           # (8,12)
            acc2 = acc2 + dot(s, t2_ref[c * 5 + dy])
    a2 = jnp.maximum(acc2 + b2_ref[...], 0.0)

    # ---- pool2: -> (4, 48)  [rows i, lanes o*4+j]
    m2 = jnp.maximum(dot(a2, c2e_ref[...]), dot(a2, c2o_ref[...]))   # (8,48)
    p2 = jnp.maximum(dot(r2e_ref[...], m2), dot(r2o_ref[...], m2))   # (4,48)

    # ---- flatten to PyTorch NCHW order: (1, 192), k = o*16 + i*4 + j
    g = dot(p2, selb_ref[...])                                       # (4,192)
    flat = jnp.sum(sela_ref[...] * g, axis=0, keepdims=True)         # (1,192)

    # ---- fully-connected chain
    h1 = jnp.maximum(dot(flat, fc1w_ref[...]) + fc1b_ref[...], 0.0)
    h2 = jnp.maximum(dot(h1, fc2w_ref[...]) + fc2b_ref[...], 0.0)
    out_ref[0] = dot(h2, ow_ref[...]) + ob_ref[...]


# ----------------------------------------------------------------------------
# Host-side one-time parameter packing (Toeplitz slabs + selection matrices)
# ----------------------------------------------------------------------------
def pack_params(p):
    w1 = np.asarray(p["conv1_w"], np.float32)   # (6, 1, 5, 5)
    b1 = np.asarray(p["conv1_b"], np.float32)   # (6,)
    w2 = np.asarray(p["conv2_w"], np.float32)   # (12, 6, 5, 5)
    b2 = np.asarray(p["conv2_b"], np.float32)   # (12,)

    # conv1 Toeplitz: t1[dy, w, o*24+x] = w1[o,0,dy,w-x]  (0 <= w-x < 5)
    t1 = np.zeros((5, 28, 6 * 24), np.float32)
    for dy in range(5):
        for o in range(6):
            for x in range(24):
                for dx in range(5):
                    t1[dy, x + dx, o * 24 + x] = w1[o, 0, dy, dx]
    b1r = np.repeat(b1, 24)[None, :]            # (1, 144)

    # conv2 Toeplitz: t2[c*5+dy, w, o*8+x] = w2[o,c,dy,w-x]
    t2 = np.zeros((6 * 5, 12, 12 * 8), np.float32)
    for c in range(6):
        for dy in range(5):
            for o in range(12):
                for x in range(8):
                    for dx in range(5):
                        t2[c * 5 + dy, x + dx, o * 8 + x] = w2[o, c, dy, dx]
    b2r = np.repeat(b2, 8)[None, :]             # (1, 96)

    # pooling selection matrices (exact 0/1)
    def lane_sel(channels, width, parity):
        half = width // 2
        s = np.zeros((channels * width, channels * half), np.float32)
        for c in range(channels):
            for j in range(half):
                s[c * width + 2 * j + parity, c * half + j] = 1.0
        return s

    def row_sel(height, parity):
        half = height // 2
        s = np.zeros((half, height), np.float32)
        for i in range(half):
            s[i, 2 * i + parity] = 1.0
        return s

    c1e, c1o = lane_sel(6, 24, 0), lane_sel(6, 24, 1)
    r1e, r1o = row_sel(24, 0), row_sel(24, 1)
    c2e, c2o = lane_sel(12, 8, 0), lane_sel(12, 8, 1)
    r2e, r2o = row_sel(8, 0), row_sel(8, 1)

    # flatten selection: k = o*16 + i*4 + j  (PyTorch NCHW flatten order)
    selb = np.zeros((48, 192), np.float32)      # lane gather: m = o*4+j -> k
    sela = np.zeros((4, 192), np.float32)       # row one-hot: i(k)
    for o in range(12):
        for i in range(4):
            for j in range(4):
                k = o * 16 + i * 4 + j
                selb[o * 4 + j, k] = 1.0
                sela[i, k] = 1.0

    return dict(
        t1=jnp.asarray(t1), b1r=jnp.asarray(b1r),
        c1e=jnp.asarray(c1e), c1o=jnp.asarray(c1o),
        r1e=jnp.asarray(r1e), r1o=jnp.asarray(r1o),
        t2=jnp.asarray(t2), b2r=jnp.asarray(b2r),
        c2e=jnp.asarray(c2e), c2o=jnp.asarray(c2o),
        r2e=jnp.asarray(r2e), r2o=jnp.asarray(r2o),
        selb=jnp.asarray(selb), sela=jnp.asarray(sela),
        fc1w=p["fc1_w"], fc1b=p["fc1_b"].reshape(1, -1),
        fc2w=p["fc2_w"], fc2b=p["fc2_b"].reshape(1, -1),
        outw=p["out_w"], outb=p["out_b"].reshape(1, -1),
    )


# ----------------------------------------------------------------------------
# Forward wrapper: one fused pallas_call over a batch grid
# ----------------------------------------------------------------------------
def my_nn_forward(x_nchw, packed):
    """Pallas implementation of My_NN.forward.  x: (B, 1, 28, 28) float32."""
    B, C, H, W = x_nchw.shape
    assert (C, H, W) == (1, 28, 28), (C, H, W)
    x = x_nchw.reshape(B, H, W)
    out_dim = packed["outb"].shape[1]

    operands = [
        x,
        packed["t1"], packed["b1r"],
        packed["c1e"], packed["c1o"], packed["r1e"], packed["r1o"],
        packed["t2"], packed["b2r"],
        packed["c2e"], packed["c2o"], packed["r2e"], packed["r2o"],
        packed["selb"], packed["sela"],
        packed["fc1w"], packed["fc1b"],
        packed["fc2w"], packed["fc2b"],
        packed["outw"], packed["outb"],
    ]

    def whole(a):
        idx = {2: (lambda i: (0, 0)), 3: (lambda i: (0, 0, 0))}[a.ndim]
        return pl.BlockSpec(tuple(int(d) for d in a.shape), idx)

    in_specs = [pl.BlockSpec((1, 28, 28), lambda i: (i, 0, 0))]
    in_specs += [whole(a) for a in operands[1:]]

    out = pl.pallas_call(
        _lenet_fused_kernel,
        out_shape=jax.ShapeDtypeStruct((B, 1, out_dim), jnp.float32),
        grid=(B,),
        in_specs=in_specs,
        out_specs=pl.BlockSpec((1, 1, out_dim), lambda i: (i, 0, 0)),
        scratch_shapes=[pltpu.VMEM((12, 72), jnp.float32)],
        compiler_params=pltpu.CompilerParams(
            dimension_semantics=("parallel",)),
    )(*operands)
    return out.reshape(B, out_dim)


# ----------------------------------------------------------------------------
# Model parameters (PyTorch-default-like init) + pure-JAX reference
# ----------------------------------------------------------------------------
def init_params(key, hidden_dim_1, hidden_dim_2, output_dim):
    def uni(k, shape, fan_in):
        bound = 1.0 / np.sqrt(fan_in)
        return jax.random.uniform(k, shape, jnp.float32, -bound, bound)

    ks = jax.random.split(key, 10)
    p = {}
    p["conv1_w"] = uni(ks[0], (6, 1, 5, 5), 1 * 5 * 5)
    p["conv1_b"] = uni(ks[1], (6,), 1 * 5 * 5)
    p["conv2_w"] = uni(ks[2], (12, 6, 5, 5), 6 * 5 * 5)
    p["conv2_b"] = uni(ks[3], (12,), 6 * 5 * 5)
    fc_in = 12 * 4 * 4
    p["fc1_w"] = uni(ks[4], (fc_in, hidden_dim_1), fc_in)
    p["fc1_b"] = uni(ks[5], (hidden_dim_1,), fc_in)
    p["fc2_w"] = uni(ks[6], (hidden_dim_1, hidden_dim_2), hidden_dim_1)
    p["fc2_b"] = uni(ks[7], (hidden_dim_2,), hidden_dim_1)
    p["out_w"] = uni(ks[8], (hidden_dim_2, output_dim), hidden_dim_2)
    p["out_b"] = uni(ks[9], (output_dim,), hidden_dim_2)
    return p


def ref_forward(x, p):
    dn = ("NCHW", "OIHW", "NCHW")

    def conv_relu(x, w, b):
        y = jax.lax.conv_general_dilated(x, w, (1, 1), "VALID",
                                         dimension_numbers=dn)
        return jnp.maximum(y + b[None, :, None, None], 0.0)

    def pool(x):
        return jax.lax.reduce_window(
            x, -jnp.inf, jax.lax.max, (1, 1, 2, 2), (1, 1, 2, 2), "VALID")

    y = pool(conv_relu(x, p["conv1_w"], p["conv1_b"]))
    y = pool(conv_relu(y, p["conv2_w"], p["conv2_b"]))
    flat = y.reshape(y.shape[0], -1)
    h1 = jnp.maximum(flat @ p["fc1_w"] + p["fc1_b"], 0.0)
    h2 = jnp.maximum(h1 @ p["fc2_w"] + p["fc2_b"], 0.0)
    return h2 @ p["out_w"] + p["out_b"]


# ----------------------------------------------------------------------------
if __name__ == "__main__":
    hidden_dim_1, hidden_dim_2, output_dim = 32, 32, 10
    batch = 2

    key = jax.random.PRNGKey(0)
    k_x, k_p = jax.random.split(key)
    x = jax.random.normal(k_x, (batch, 1, 28, 28), jnp.float32)
    params = init_params(k_p, hidden_dim_1, hidden_dim_2, output_dim)
    packed = pack_params(params)

    out = jax.block_until_ready(my_nn_forward(x, packed))
    assert out.shape == (batch, output_dim), out.shape

    ref = jax.block_until_ready(ref_forward(x, params))
    np.testing.assert_allclose(np.asarray(out), np.asarray(ref),
                               rtol=1e-3, atol=1e-3)

    print("KERNEL_OK")
</pallas_src>

<mosaic_0001>
module attributes {stable_mosaic.version = 11 : i64} {
  func.func @_lenet_fused_kernel(%arg0: i32, %arg1: memref<1x28x28xf32, #tpu.memory_space<vmem>>, %arg2: memref<5x28x144xf32, #tpu.memory_space<vmem>>, %arg3: memref<1x144xf32, #tpu.memory_space<vmem>>, %arg4: memref<144x72xf32, #tpu.memory_space<vmem>>, %arg5: memref<144x72xf32, #tpu.memory_space<vmem>>, %arg6: memref<12x24xf32, #tpu.memory_space<vmem>>, %arg7: memref<12x24xf32, #tpu.memory_space<vmem>>, %arg8: memref<30x12x96xf32, #tpu.memory_space<vmem>>, %arg9: memref<1x96xf32, #tpu.memory_space<vmem>>, %arg10: memref<96x48xf32, #tpu.memory_space<vmem>>, %arg11: memref<96x48xf32, #tpu.memory_space<vmem>>, %arg12: memref<4x8xf32, #tpu.memory_space<vmem>>, %arg13: memref<4x8xf32, #tpu.memory_space<vmem>>, %arg14: memref<48x192xf32, #tpu.memory_space<vmem>>, %arg15: memref<4x192xf32, #tpu.memory_space<vmem>>, %arg16: memref<192x32xf32, #tpu.memory_space<vmem>>, %arg17: memref<1x32xf32, #tpu.memory_space<vmem>>, %arg18: memref<32x32xf32, #tpu.memory_space<vmem>>, %arg19: memref<1x32xf32, #tpu.memory_space<vmem>>, %arg20: memref<32x10xf32, #tpu.memory_space<vmem>>, %arg21: memref<1x10xf32, #tpu.memory_space<vmem>>, %arg22: memref<1x1x10xf32, #tpu.memory_space<vmem>>, %arg23: memref<12x72xf32, #tpu.memory_space<vmem>>) attributes {dimension_semantics = [#tpu.dimension_semantics<parallel>], iteration_bounds = array<i64: 2>, scalar_prefetch = 0 : i64, scratch_operands = 1 : i64, tpu.core_type = #tpu.core_type<tc>, window_params = [{transform_indices = @transform_0, window_bounds = array<i64: 1, 28, 28>}, {pipeline_mode = #tpu.pipeline_mode<synchronous>, transform_indices = @transform_1, window_bounds = array<i64: 5, 28, 144>}, {pipeline_mode = #tpu.pipeline_mode<synchronous>, transform_indices = @transform_2, window_bounds = array<i64: 1, 144>}, {pipeline_mode = #tpu.pipeline_mode<synchronous>, transform_indices = @transform_3, window_bounds = array<i64: 144, 72>}, {pipeline_mode = #tpu.pipeline_mode<synchronous>, transform_indices = @transform_4, window_bounds = array<i64: 144, 72>}, {pipeline_mode = #tpu.pipeline_mode<synchronous>, transform_indices = @transform_5, window_bounds = array<i64: 12, 24>}, {pipeline_mode = #tpu.pipeline_mode<synchronous>, transform_indices = @transform_6, window_bounds = array<i64: 12, 24>}, {pipeline_mode = #tpu.pipeline_mode<synchronous>, transform_indices = @transform_7, window_bounds = array<i64: 30, 12, 96>}, {pipeline_mode = #tpu.pipeline_mode<synchronous>, transform_indices = @transform_8, window_bounds = array<i64: 1, 96>}, {pipeline_mode = #tpu.pipeline_mode<synchronous>, transform_indices = @transform_9, window_bounds = array<i64: 96, 48>}, {pipeline_mode = #tpu.pipeline_mode<synchronous>, transform_indices = @transform_10, window_bounds = array<i64: 96, 48>}, {pipeline_mode = #tpu.pipeline_mode<synchronous>, transform_indices = @transform_11, window_bounds = array<i64: 4, 8>}, {pipeline_mode = #tpu.pipeline_mode<synchronous>, transform_indices = @transform_12, window_bounds = array<i64: 4, 8>}, {pipeline_mode = #tpu.pipeline_mode<synchronous>, transform_indices = @transform_13, window_bounds = array<i64: 48, 192>}, {pipeline_mode = #tpu.pipeline_mode<synchronous>, transform_indices = @transform_14, window_bounds = array<i64: 4, 192>}, {pipeline_mode = #tpu.pipeline_mode<synchronous>, transform_indices = @transform_15, window_bounds = array<i64: 192, 32>}, {pipeline_mode = #tpu.pipeline_mode<synchronous>, transform_indices = @transform_16, window_bounds = array<i64: 1, 32>}, {pipeline_mode = #tpu.pipeline_mode<synchronous>, transform_indices = @transform_17, window_bounds = array<i64: 32, 32>}, {pipeline_mode = #tpu.pipeline_mode<synchronous>, transform_indices = @transform_18, window_bounds = array<i64: 1, 32>}, {pipeline_mode = #tpu.pipeline_mode<synchronous>, transform_indices = @transform_19, window_bounds = array<i64: 32, 10>}, {pipeline_mode = #tpu.pipeline_mode<synchronous>, transform_indices = @transform_20, window_bounds = array<i64: 1, 10>}, {transform_indices = @transform_21, window_bounds = array<i64: 1, 1, 10>}]} {
    %cst = arith.constant 0.000000e+00 : f32
    %0 = vector.broadcast %cst : f32 to vector<24x144xf32>
    %c0 = arith.constant 0 : index
    %c0_0 = arith.constant 0 : index
    %c0_1 = arith.constant 0 : index
    %1 = vector.load %arg1[%c0, %c0_0, %c0_1] : memref<1x28x28xf32, #tpu.memory_space<vmem>>, vector<1x24x28xf32>
    %2 = vector.shape_cast %1 : vector<1x24x28xf32> to vector<24x28xf32>
    %c0_2 = arith.constant 0 : index
    %c0_3 = arith.constant 0 : index
    %c0_4 = arith.constant 0 : index
    %3 = vector.load %arg2[%c0_2, %c0_3, %c0_4] : memref<5x28x144xf32, #tpu.memory_space<vmem>>, vector<1x28x144xf32>
    %4 = vector.shape_cast %3 : vector<1x28x144xf32> to vector<28x144xf32>
    %cst_5 = arith.constant dense<0.000000e+00> : vector<24x144xf32>
    %5 = tpu.matmul %2, %4, %cst_5 {dimension_numbers = #tpu.dot_dimension_numbers<[1], [0], [0], [1], [0, 0, 1, 1], [], []>} : vector<24x28xf32>, vector<28x144xf32>, vector<24x144xf32> -> vector<24x144xf32>
    %6 = arith.addf %0, %5 : vector<24x144xf32>
    %c0_6 = arith.constant 0 : index
    %c1 = arith.constant 1 : index
    %c0_7 = arith.constant 0 : index
    %7 = vector.load %arg1[%c0_6, %c1, %c0_7] : memref<1x28x28xf32, #tpu.memory_space<vmem>>, vector<1x24x28xf32>
    %8 = vector.shape_cast %7 : vector<1x24x28xf32> to vector<24x28xf32>
    %c1_8 = arith.constant 1 : index
    %c0_9 = arith.constant 0 : index
    %c0_10 = arith.constant 0 : index
    %9 = vector.load %arg2[%c1_8, %c0_9, %c0_10] : memref<5x28x144xf32, #tpu.memory_space<vmem>>, vector<1x28x144xf32>
    %10 = vector.shape_cast %9 : vector<1x28x144xf32> to vector<28x144xf32>
    %cst_11 = arith.constant dense<0.000000e+00> : vector<24x144xf32>
    %11 = tpu.matmul %8, %10, %cst_11 {dimension_numbers = #tpu.dot_dimension_numbers<[1], [0], [0], [1], [0, 0, 1, 1], [], []>} : vector<24x28xf32>, vector<28x144xf32>, vector<24x144xf32> -> vector<24x144xf32>
    %12 = arith.addf %6, %11 : vector<24x144xf32>
    %c0_12 = arith.constant 0 : index
    %c2 = arith.constant 2 : index
    %c0_13 = arith.constant 0 : index
    %13 = vector.load %arg1[%c0_12, %c2, %c0_13] : memref<1x28x28xf32, #tpu.memory_space<vmem>>, vector<1x24x28xf32>
    %14 = vector.shape_cast %13 : vector<1x24x28xf32> to vector<24x28xf32>
    %c2_14 = arith.constant 2 : index
    %c0_15 = arith.constant 0 : index
    %c0_16 = arith.constant 0 : index
    %15 = vector.load %arg2[%c2_14, %c0_15, %c0_16] : memref<5x28x144xf32, #tpu.memory_space<vmem>>, vector<1x28x144xf32>
    %16 = vector.shape_cast %15 : vector<1x28x144xf32> to vector<28x144xf32>
    %cst_17 = arith.constant dense<0.000000e+00> : vector<24x144xf32>
    %17 = tpu.matmul %14, %16, %cst_17 {dimension_numbers = #tpu.dot_dimension_numbers<[1], [0], [0], [1], [0, 0, 1, 1], [], []>} : vector<24x28xf32>, vector<28x144xf32>, vector<24x144xf32> -> vector<24x144xf32>
    %18 = arith.addf %12, %17 : vector<24x144xf32>
    %c0_18 = arith.constant 0 : index
    %c3 = arith.constant 3 : index
    %c0_19 = arith.constant 0 : index
    %19 = vector.load %arg1[%c0_18, %c3, %c0_19] : memref<1x28x28xf32, #tpu.memory_space<vmem>>, vector<1x24x28xf32>
    %20 = vector.shape_cast %19 : vector<1x24x28xf32> to vector<24x28xf32>
    %c3_20 = arith.constant 3 : index
    %c0_21 = arith.constant 0 : index
    %c0_22 = arith.constant 0 : index
    %21 = vector.load %arg2[%c3_20, %c0_21, %c0_22] : memref<5x28x144xf32, #tpu.memory_space<vmem>>, vector<1x28x144xf32>
    %22 = vector.shape_cast %21 : vector<1x28x144xf32> to vector<28x144xf32>
    %cst_23 = arith.constant dense<0.000000e+00> : vector<24x144xf32>
    %23 = tpu.matmul %20, %22, %cst_23 {dimension_numbers = #tpu.dot_dimension_numbers<[1], [0], [0], [1], [0, 0, 1, 1], [], []>} : vector<24x28xf32>, vector<28x144xf32>, vector<24x144xf32> -> vector<24x144xf32>
    %24 = arith.addf %18, %23 : vector<24x144xf32>
    %c0_24 = arith.constant 0 : index
    %c4 = arith.constant 4 : index
    %c0_25 = arith.constant 0 : index
    %25 = vector.load %arg1[%c0_24, %c4, %c0_25] : memref<1x28x28xf32, #tpu.memory_space<vmem>>, vector<1x24x28xf32>
    %26 = vector.shape_cast %25 : vector<1x24x28xf32> to vector<24x28xf32>
    %c4_26 = arith.constant 4 : index
    %c0_27 = arith.constant 0 : index
    %c0_28 = arith.constant 0 : index
    %27 = vector.load %arg2[%c4_26, %c0_27, %c0_28] : memref<5x28x144xf32, #tpu.memory_space<vmem>>, vector<1x28x144xf32>
    %28 = vector.shape_cast %27 : vector<1x28x144xf32> to vector<28x144xf32>
    %cst_29 = arith.constant dense<0.000000e+00> : vector<24x144xf32>
    %29 = tpu.matmul %26, %28, %cst_29 {dimension_numbers = #tpu.dot_dimension_numbers<[1], [0], [0], [1], [0, 0, 1, 1], [], []>} : vector<24x28xf32>, vector<28x144xf32>, vector<24x144xf32> -> vector<24x144xf32>
    %30 = arith.addf %24, %29 : vector<24x144xf32>
    %c0_30 = arith.constant 0 : index
    %c0_31 = arith.constant 0 : index
    %31 = vector.load %arg3[%c0_30, %c0_31] : memref<1x144xf32, #tpu.memory_space<vmem>>, vector<1x144xf32>
    %32 = vector.broadcast %31 : vector<1x144xf32> to vector<24x144xf32>
    %33 = arith.addf %30, %32 : vector<24x144xf32>
    %cst_32 = arith.constant 0.000000e+00 : f32
    %34 = vector.broadcast %cst_32 : f32 to vector<24x144xf32>
    %35 = arith.maximumf %33, %34 : vector<24x144xf32>
    %c0_33 = arith.constant 0 : index
    %c0_34 = arith.constant 0 : index
    %36 = vector.load %arg4[%c0_33, %c0_34] : memref<144x72xf32, #tpu.memory_space<vmem>>, vector<144x72xf32>
    %cst_35 = arith.constant dense<0.000000e+00> : vector<24x72xf32>
    %37 = tpu.matmul %35, %36, %cst_35 {dimension_numbers = #tpu.dot_dimension_numbers<[1], [0], [0], [1], [0, 0, 1, 1], [], []>} : vector<24x144xf32>, vector<144x72xf32>, vector<24x72xf32> -> vector<24x72xf32>
    %c0_36 = arith.constant 0 : index
    %c0_37 = arith.constant 0 : index
    %38 = vector.load %arg5[%c0_36, %c0_37] : memref<144x72xf32, #tpu.memory_space<vmem>>, vector<144x72xf32>
    %cst_38 = arith.constant dense<0.000000e+00> : vector<24x72xf32>
    %39 = tpu.matmul %35, %38, %cst_38 {dimension_numbers = #tpu.dot_dimension_numbers<[1], [0], [0], [1], [0, 0, 1, 1], [], []>} : vector<24x144xf32>, vector<144x72xf32>, vector<24x72xf32> -> vector<24x72xf32>
    %40 = arith.maximumf %37, %39 : vector<24x72xf32>
    %c0_39 = arith.constant 0 : index
    %c0_40 = arith.constant 0 : index
    %41 = vector.load %arg6[%c0_39, %c0_40] : memref<12x24xf32, #tpu.memory_space<vmem>>, vector<12x24xf32>
    %cst_41 = arith.constant dense<0.000000e+00> : vector<12x72xf32>
    %42 = tpu.matmul %41, %40, %cst_41 {dimension_numbers = #tpu.dot_dimension_numbers<[1], [0], [0], [1], [0, 0, 1, 1], [], []>} : vector<12x24xf32>, vector<24x72xf32>, vector<12x72xf32> -> vector<12x72xf32>
    %c0_42 = arith.constant 0 : index
    %c0_43 = arith.constant 0 : index
    %43 = vector.load %arg7[%c0_42, %c0_43] : memref<12x24xf32, #tpu.memory_space<vmem>>, vector<12x24xf32>
    %cst_44 = arith.constant dense<0.000000e+00> : vector<12x72xf32>
    %44 = tpu.matmul %43, %40, %cst_44 {dimension_numbers = #tpu.dot_dimension_numbers<[1], [0], [0], [1], [0, 0, 1, 1], [], []>} : vector<12x24xf32>, vector<24x72xf32>, vector<12x72xf32> -> vector<12x72xf32>
    %45 = arith.maximumf %42, %44 : vector<12x72xf32>
    %c0_45 = arith.constant 0 : index
    %c0_46 = arith.constant 0 : index
    %46 = vector.load %arg23[%c0_45, %c0_46] : memref<12x72xf32, #tpu.memory_space<vmem>>, vector<12x72xf32>
    tpu.vector_store %arg23[%c0_45, %c0_46], %45 {strides = array<i32>} : memref<12x72xf32, #tpu.memory_space<vmem>>, vector<12x72xf32>,
    %cst_47 = arith.constant 0.000000e+00 : f32
    %47 = vector.broadcast %cst_47 : f32 to vector<8x96xf32>
    %c0_48 = arith.constant 0 : index
    %c0_49 = arith.constant 0 : index
    %48 = vector.load %arg23[%c0_48, %c0_49] : memref<12x72xf32, #tpu.memory_space<vmem>>, vector<8x12xf32>
    %c0_50 = arith.constant 0 : index
    %c0_51 = arith.constant 0 : index
    %c0_52 = arith.constant 0 : index
    %49 = vector.load %arg8[%c0_50, %c0_51, %c0_52] : memref<30x12x96xf32, #tpu.memory_space<vmem>>, vector<1x12x96xf32>
    %50 = vector.shape_cast %49 : vector<1x12x96xf32> to vector<12x96xf32>
    %cst_53 = arith.constant dense<0.000000e+00> : vector<8x96xf32>
    %51 = tpu.matmul %48, %50, %cst_53 {dimension_numbers = #tpu.dot_dimension_numbers<[1], [0], [0], [1], [0, 0, 1, 1], [], []>} : vector<8x12xf32>, vector<12x96xf32>, vector<8x96xf32> -> vector<8x96xf32>
    %52 = arith.addf %47, %51 : vector<8x96xf32>
    %c1_54 = arith.constant 1 : index
    %c0_55 = arith.constant 0 : index
    %53 = vector.load %arg23[%c1_54, %c0_55] : memref<12x72xf32, #tpu.memory_space<vmem>>, vector<8x12xf32>
    %c1_56 = arith.constant 1 : index
    %c0_57 = arith.constant 0 : index
    %c0_58 = arith.constant 0 : index
    %54 = vector.load %arg8[%c1_56, %c0_57, %c0_58] : memref<30x12x96xf32, #tpu.memory_space<vmem>>, vector<1x12x96xf32>
    %55 = vector.shape_cast %54 : vector<1x12x96xf32> to vector<12x96xf32>
    %cst_59 = arith.constant dense<0.000000e+00> : vector<8x96xf32>
    %56 = tpu.matmul %53, %55, %cst_59 {dimension_numbers = #tpu.dot_dimension_numbers<[1], [0], [0], [1], [0, 0, 1, 1], [], []>} : vector<8x12xf32>, vector<12x96xf32>, vector<8x96xf32> -> vector<8x96xf32>
    %57 = arith.addf %52, %56 : vector<8x96xf32>
    %c2_60 = arith.constant 2 : index
    %c0_61 = arith.constant 0 : index
    %58 = vector.load %arg23[%c2_60, %c0_61] : memref<12x72xf32, #tpu.memory_space<vmem>>, vector<8x12xf32>
    %c2_62 = arith.constant 2 : index
    %c0_63 = arith.constant 0 : index
    %c0_64 = arith.constant 0 : index
    %59 = vector.load %arg8[%c2_62, %c0_63, %c0_64] : memref<30x12x96xf32, #tpu.memory_space<vmem>>, vector<1x12x96xf32>
    %60 = vector.shape_cast %59 : vector<1x12x96xf32> to vector<12x96xf32>
    %cst_65 = arith.constant dense<0.000000e+00> : vector<8x96xf32>
    %61 = tpu.matmul %58, %60, %cst_65 {dimension_numbers = #tpu.dot_dimension_numbers<[1], [0], [0], [1], [0, 0, 1, 1], [], []>} : vector<8x12xf32>, vector<12x96xf32>, vector<8x96xf32> -> vector<8x96xf32>
    %62 = arith.addf %57, %61 : vector<8x96xf32>
    %c3_66 = arith.constant 3 : index
    %c0_67 = arith.constant 0 : index
    %63 = vector.load %arg23[%c3_66, %c0_67] : memref<12x72xf32, #tpu.memory_space<vmem>>, vector<8x12xf32>
    %c3_68 = arith.constant 3 : index
    %c0_69 = arith.constant 0 : index
    %c0_70 = arith.constant 0 : index
    %64 = vector.load %arg8[%c3_68, %c0_69, %c0_70] : memref<30x12x96xf32, #tpu.memory_space<vmem>>, vector<1x12x96xf32>
    %65 = vector.shape_cast %64 : vector<1x12x96xf32> to vector<12x96xf32>
    %cst_71 = arith.constant dense<0.000000e+00> : vector<8x96xf32>
    %66 = tpu.matmul %63, %65, %cst_71 {dimension_numbers = #tpu.dot_dimension_numbers<[1], [0], [0], [1], [0, 0, 1, 1], [], []>} : vector<8x12xf32>, vector<12x96xf32>, vector<8x96xf32> -> vector<8x96xf32>
    %67 = arith.addf %62, %66 : vector<8x96xf32>
    %c4_72 = arith.constant 4 : index
    %c0_73 = arith.constant 0 : index
    %68 = vector.load %arg23[%c4_72, %c0_73] : memref<12x72xf32, #tpu.memory_space<vmem>>, vector<8x12xf32>
    %c4_74 = arith.constant 4 : index
    %c0_75 = arith.constant 0 : index
    %c0_76 = arith.constant 0 : index
    %69 = vector.load %arg8[%c4_74, %c0_75, %c0_76] : memref<30x12x96xf32, #tpu.memory_space<vmem>>, vector<1x12x96xf32>
    %70 = vector.shape_cast %69 : vector<1x12x96xf32> to vector<12x96xf32>
    %cst_77 = arith.constant dense<0.000000e+00> : vector<8x96xf32>
    %71 = tpu.matmul %68, %70, %cst_77 {dimension_numbers = #tpu.dot_dimension_numbers<[1], [0], [0], [1], [0, 0, 1, 1], [], []>} : vector<8x12xf32>, vector<12x96xf32>, vector<8x96xf32> -> vector<8x96xf32>
    %72 = arith.addf %67, %71 : vector<8x96xf32>
    %c0_78 = arith.constant 0 : index
    %c12 = arith.constant 12 : index
    %73 = vector.load %arg23[%c0_78, %c12] : memref<12x72xf32, #tpu.memory_space<vmem>>, vector<8x12xf32>
    %c5 = arith.constant 5 : index
    %c0_79 = arith.constant 0 : index
    %c0_80 = arith.constant 0 : index
    %74 = vector.load %arg8[%c5, %c0_79, %c0_80] : memref<30x12x96xf32, #tpu.memory_space<vmem>>, vector<1x12x96xf32>
    %75 = vector.shape_cast %74 : vector<1x12x96xf32> to vector<12x96xf32>
    %cst_81 = arith.constant dense<0.000000e+00> : vector<8x96xf32>
    %76 = tpu.matmul %73, %75, %cst_81 {dimension_numbers = #tpu.dot_dimension_numbers<[1], [0], [0], [1], [0, 0, 1, 1], [], []>} : vector<8x12xf32>, vector<12x96xf32>, vector<8x96xf32> -> vector<8x96xf32>
    %77 = arith.addf %72, %76 : vector<8x96xf32>
    %c1_82 = arith.constant 1 : index
    %c12_83 = arith.constant 12 : index
    %78 = vector.load %arg23[%c1_82, %c12_83] : memref<12x72xf32, #tpu.memory_space<vmem>>, vector<8x12xf32>
    %c6 = arith.constant 6 : index
    %c0_84 = arith.constant 0 : index
    %c0_85 = arith.constant 0 : index
    %79 = vector.load %arg8[%c6, %c0_84, %c0_85] : memref<30x12x96xf32, #tpu.memory_space<vmem>>, vector<1x12x96xf32>
    %80 = vector.shape_cast %79 : vector<1x12x96xf32> to vector<12x96xf32>
    %cst_86 = arith.constant dense<0.000000e+00> : vector<8x96xf32>
    %81 = tpu.matmul %78, %80, %cst_86 {dimension_numbers = #tpu.dot_dimension_numbers<[1], [0], [0], [1], [0, 0, 1, 1], [], []>} : vector<8x12xf32>, vector<12x96xf32>, vector<8x96xf32> -> vector<8x96xf32>
    %82 = arith.addf %77, %81 : vector<8x96xf32>
    %c2_87 = arith.constant 2 : index
    %c12_88 = arith.constant 12 : index
    %83 = vector.load %arg23[%c2_87, %c12_88] : memref<12x72xf32, #tpu.memory_space<vmem>>, vector<8x12xf32>
    %c7 = arith.constant 7 : index
    %c0_89 = arith.constant 0 : index
    %c0_90 = arith.constant 0 : index
    %84 = vector.load %arg8[%c7, %c0_89, %c0_90] : memref<30x12x96xf32, #tpu.memory_space<vmem>>, vector<1x12x96xf32>
    %85 = vector.shape_cast %84 : vector<1x12x96xf32> to vector<12x96xf32>
    %cst_91 = arith.constant dense<0.000000e+00> : vector<8x96xf32>
    %86 = tpu.matmul %83, %85, %cst_91 {dimension_numbers = #tpu.dot_dimension_numbers<[1], [0], [0], [1], [0, 0, 1, 1], [], []>} : vector<8x12xf32>, vector<12x96xf32>, vector<8x96xf32> -> vector<8x96xf32>
    %87 = arith.addf %82, %86 : vector<8x96xf32>
    %c3_92 = arith.constant 3 : index
    %c12_93 = arith.constant 12 : index
    %88 = vector.load %arg23[%c3_92, %c12_93] : memref<12x72xf32, #tpu.memory_space<vmem>>, vector<8x12xf32>
    %c8 = arith.constant 8 : index
    %c0_94 = arith.constant 0 : index
    %c0_95 = arith.constant 0 : index
    %89 = vector.load %arg8[%c8, %c0_94, %c0_95] : memref<30x12x96xf32, #tpu.memory_space<vmem>>, vector<1x12x96xf32>
    %90 = vector.shape_cast %89 : vector<1x12x96xf32> to vector<12x96xf32>
    %cst_96 = arith.constant dense<0.000000e+00> : vector<8x96xf32>
    %91 = tpu.matmul %88, %90, %cst_96 {dimension_numbers = #tpu.dot_dimension_numbers<[1], [0], [0], [1], [0, 0, 1, 1], [], []>} : vector<8x12xf32>, vector<12x96xf32>, vector<8x96xf32> -> vector<8x96xf32>
    %92 = arith.addf %87, %91 : vector<8x96xf32>
    %c4_97 = arith.constant 4 : index
    %c12_98 = arith.constant 12 : index
    %93 = vector.load %arg23[%c4_97, %c12_98] : memref<12x72xf32, #tpu.memory_space<vmem>>, vector<8x12xf32>
    %c9 = arith.constant 9 : index
    %c0_99 = arith.constant 0 : index
    %c0_100 = arith.constant 0 : index
    %94 = vector.load %arg8[%c9, %c0_99, %c0_100] : memref<30x12x96xf32, #tpu.memory_space<vmem>>, vector<1x12x96xf32>
    %95 = vector.shape_cast %94 : vector<1x12x96xf32> to vector<12x96xf32>
    %cst_101 = arith.constant dense<0.000000e+00> : vector<8x96xf32>
    %96 = tpu.matmul %93, %95, %cst_101 {dimension_numbers = #tpu.dot_dimension_numbers<[1], [0], [0], [1], [0, 0, 1, 1], [], []>} : vector<8x12xf32>, vector<12x96xf32>, vector<8x96xf32> -> vector<8x96xf32>
    %97 = arith.addf %92, %96 : vector<8x96xf32>
    %c0_102 = arith.constant 0 : index
    %c24 = arith.constant 24 : index
    %98 = vector.load %arg23[%c0_102, %c24] : memref<12x72xf32, #tpu.memory_space<vmem>>, vector<8x12xf32>
    %c10 = arith.constant 10 : index
    %c0_103 = arith.constant 0 : index
    %c0_104 = arith.constant 0 : index
    %99 = vector.load %arg8[%c10, %c0_103, %c0_104] : memref<30x12x96xf32, #tpu.memory_space<vmem>>, vector<1x12x96xf32>
    %100 = vector.shape_cast %99 : vector<1x12x96xf32> to vector<12x96xf32>
    %cst_105 = arith.constant dense<0.000000e+00> : vector<8x96xf32>
    %101 = tpu.matmul %98, %100, %cst_105 {dimension_numbers = #tpu.dot_dimension_numbers<[1], [0], [0], [1], [0, 0, 1, 1], [], []>} : vector<8x12xf32>, vector<12x96xf32>, vector<8x96xf32> -> vector<8x96xf32>
    %102 = arith.addf %97, %101 : vector<8x96xf32>
    %c1_106 = arith.constant 1 : index
    %c24_107 = arith.constant 24 : index
    %103 = vector.load %arg23[%c1_106, %c24_107] : memref<12x72xf32, #tpu.memory_space<vmem>>, vector<8x12xf32>
    %c11 = arith.constant 11 : index
    %c0_108 = arith.constant 0 : index
    %c0_109 = arith.constant 0 : index
    %104 = vector.load %arg8[%c11, %c0_108, %c0_109] : memref<30x12x96xf32, #tpu.memory_space<vmem>>, vector<1x12x96xf32>
    %105 = vector.shape_cast %104 : vector<1x12x96xf32> to vector<12x96xf32>
    %cst_110 = arith.constant dense<0.000000e+00> : vector<8x96xf32>
    %106 = tpu.matmul %103, %105, %cst_110 {dimension_numbers = #tpu.dot_dimension_numbers<[1], [0], [0], [1], [0, 0, 1, 1], [], []>} : vector<8x12xf32>, vector<12x96xf32>, vector<8x96xf32> -> vector<8x96xf32>
    %107 = arith.addf %102, %106 : vector<8x96xf32>
    %c2_111 = arith.constant 2 : index
    %c24_112 = arith.constant 24 : index
    %108 = vector.load %arg23[%c2_111, %c24_112] : memref<12x72xf32, #tpu.memory_space<vmem>>, vector<8x12xf32>
    %c12_113 = arith.constant 12 : index
    %c0_114 = arith.constant 0 : index
    %c0_115 = arith.constant 0 : index
    %109 = vector.load %arg8[%c12_113, %c0_114, %c0_115] : memref<30x12x96xf32, #tpu.memory_space<vmem>>, vector<1x12x96xf32>
    %110 = vector.shape_cast %109 : vector<1x12x96xf32> to vector<12x96xf32>
    %cst_116 = arith.constant dense<0.000000e+00> : vector<8x96xf32>
    %111 = tpu.matmul %108, %110, %cst_116 {dimension_numbers = #tpu.dot_dimension_numbers<[1], [0], [0], [1], [0, 0, 1, 1], [], []>} : vector<8x12xf32>, vector<12x96xf32>, vector<8x96xf32> -> vector<8x96xf32>
    %112 = arith.addf %107, %111 : vector<8x96xf32>
    %c3_117 = arith.constant 3 : index
    %c24_118 = arith.constant 24 : index
    %113 = vector.load %arg23[%c3_117, %c24_118] : memref<12x72xf32, #tpu.memory_space<vmem>>, vector<8x12xf32>
    %c13 = arith.constant 13 : index
    %c0_119 = arith.constant 0 : index
    %c0_120 = arith.constant 0 : index
    %114 = vector.load %arg8[%c13, %c0_119, %c0_120] : memref<30x12x96xf32, #tpu.memory_space<vmem>>, vector<1x12x96xf32>
    %115 = vector.shape_cast %114 : vector<1x12x96xf32> to vector<12x96xf32>
    %cst_121 = arith.constant dense<0.000000e+00> : vector<8x96xf32>
    %116 = tpu.matmul %113, %115, %cst_121 {dimension_numbers = #tpu.dot_dimension_numbers<[1], [0], [0], [1], [0, 0, 1, 1], [], []>} : vector<8x12xf32>, vector<12x96xf32>, vector<8x96xf32> -> vector<8x96xf32>
    %117 = arith.addf %112, %116 : vector<8x96xf32>
    %c4_122 = arith.constant 4 : index
    %c24_123 = arith.constant 24 : index
    %118 = vector.load %arg23[%c4_122, %c24_123] : memref<12x72xf32, #tpu.memory_space<vmem>>, vector<8x12xf32>
    %c14 = arith.constant 14 : index
    %c0_124 = arith.constant 0 : index
    %c0_125 = arith.constant 0 : index
    %119 = vector.load %arg8[%c14, %c0_124, %c0_125] : memref<30x12x96xf32, #tpu.memory_space<vmem>>, vector<1x12x96xf32>
    %120 = vector.shape_cast %119 : vector<1x12x96xf32> to vector<12x96xf32>
    %cst_126 = arith.constant dense<0.000000e+00> : vector<8x96xf32>
    %121 = tpu.matmul %118, %120, %cst_126 {dimension_numbers = #tpu.dot_dimension_numbers<[1], [0], [0], [1], [0, 0, 1, 1], [], []>} : vector<8x12xf32>, vector<12x96xf32>, vector<8x96xf32> -> vector<8x96xf32>
    %122 = arith.addf %117, %121 : vector<8x96xf32>
    %c0_127 = arith.constant 0 : index
    %c36 = arith.constant 36 : index
    %123 = vector.load %arg23[%c0_127, %c36] : memref<12x72xf32, #tpu.memory_space<vmem>>, vector<8x12xf32>
    %c15 = arith.constant 15 : index
    %c0_128 = arith.constant 0 : index
    %c0_129 = arith.constant 0 : index
    %124 = vector.load %arg8[%c15, %c0_128, %c0_129] : memref<30x12x96xf32, #tpu.memory_space<vmem>>, vector<1x12x96xf32>
    %125 = vector.shape_cast %124 : vector<1x12x96xf32> to vector<12x96xf32>
    %cst_130 = arith.constant dense<0.000000e+00> : vector<8x96xf32>
    %126 = tpu.matmul %123, %125, %cst_130 {dimension_numbers = #tpu.dot_dimension_numbers<[1], [0], [0], [1], [0, 0, 1, 1], [], []>} : vector<8x12xf32>, vector<12x96xf32>, vector<8x96xf32> -> vector<8x96xf32>
    %127 = arith.addf %122, %126 : vector<8x96xf32>
    %c1_131 = arith.constant 1 : index
    %c36_132 = arith.constant 36 : index
    %128 = vector.load %arg23[%c1_131, %c36_132] : memref<12x72xf32, #tpu.memory_space<vmem>>, vector<8x12xf32>
    %c16 = arith.constant 16 : index
    %c0_133 = arith.constant 0 : index
    %c0_134 = arith.constant 0 : index
    %129 = vector.load %arg8[%c16, %c0_133, %c0_134] : memref<30x12x96xf32, #tpu.memory_space<vmem>>, vector<1x12x96xf32>
    %130 = vector.shape_cast %129 : vector<1x12x96xf32> to vector<12x96xf32>
    %cst_135 = arith.constant dense<0.000000e+00> : vector<8x96xf32>
    %131 = tpu.matmul %128, %130, %cst_135 {dimension_numbers = #tpu.dot_dimension_numbers<[1], [0], [0], [1], [0, 0, 1, 1], [], []>} : vector<8x12xf32>, vector<12x96xf32>, vector<8x96xf32> -> vector<8x96xf32>
    %132 = arith.addf %127, %131 : vector<8x96xf32>
    %c2_136 = arith.constant 2 : index
    %c36_137 = arith.constant 36 : index
    %133 = vector.load %arg23[%c2_136, %c36_137] : memref<12x72xf32, #tpu.memory_space<vmem>>, vector<8x12xf32>
    %c17 = arith.constant 17 : index
    %c0_138 = arith.constant 0 : index
    %c0_139 = arith.constant 0 : index
    %134 = vector.load %arg8[%c17, %c0_138, %c0_139] : memref<30x12x96xf32, #tpu.memory_space<vmem>>, vector<1x12x96xf32>
    %135 = vector.shape_cast %134 : vector<1x12x96xf32> to vector<12x96xf32>
    %cst_140 = arith.constant dense<0.000000e+00> : vector<8x96xf32>
    %136 = tpu.matmul %133, %135, %cst_140 {dimension_numbers = #tpu.dot_dimension_numbers<[1], [0], [0], [1], [0, 0, 1, 1], [], []>} : vector<8x12xf32>, vector<12x96xf32>, vector<8x96xf32> -> vector<8x96xf32>
    %137 = arith.addf %132, %136 : vector<8x96xf32>
    %c3_141 = arith.constant 3 : index
    %c36_142 = arith.constant 36 : index
    %138 = vector.load %arg23[%c3_141, %c36_142] : memref<12x72xf32, #tpu.memory_space<vmem>>, vector<8x12xf32>
    %c18 = arith.constant 18 : index
    %c0_143 = arith.constant 0 : index
    %c0_144 = arith.constant 0 : index
    %139 = vector.load %arg8[%c18, %c0_143, %c0_144] : memref<30x12x96xf32, #tpu.memory_space<vmem>>, vector<1x12x96xf32>
    %140 = vector.shape_cast %139 : vector<1x12x96xf32> to vector<12x96xf32>
    %cst_145 = arith.constant dense<0.000000e+00> : vector<8x96xf32>
    %141 = tpu.matmul %138, %140, %cst_145 {dimension_numbers = #tpu.dot_dimension_numbers<[1], [0], [0], [1], [0, 0, 1, 1], [], []>} : vector<8x12xf32>, vector<12x96xf32>, vector<8x96xf32> -> vector<8x96xf32>
    %142 = arith.addf %137, %141 : vector<8x96xf32>
    %c4_146 = arith.constant 4 : index
    %c36_147 = arith.constant 36 : index
    %143 = vector.load %arg23[%c4_146, %c36_147] : memref<12x72xf32, #tpu.memory_space<vmem>>, vector<8x12xf32>
    %c19 = arith.constant 19 : index
    %c0_148 = arith.constant 0 : index
    %c0_149 = arith.constant 0 : index
    %144 = vector.load %arg8[%c19, %c0_148, %c0_149] : memref<30x12x96xf32, #tpu.memory_space<vmem>>, vector<1x12x96xf32>
    %145 = vector.shape_cast %144 : vector<1x12x96xf32> to vector<12x96xf32>
    %cst_150 = arith.constant dense<0.000000e+00> : vector<8x96xf32>
    %146 = tpu.matmul %143, %145, %cst_150 {dimension_numbers = #tpu.dot_dimension_numbers<[1], [0], [0], [1], [0, 0, 1, 1], [], []>} : vector<8x12xf32>, vector<12x96xf32>, vector<8x96xf32> -> vector<8x96xf32>
    %147 = arith.addf %142, %146 : vector<8x96xf32>
    %c0_151 = arith.constant 0 : index
    %c48 = arith.constant 48 : index
    %148 = vector.load %arg23[%c0_151, %c48] : memref<12x72xf32, #tpu.memory_space<vmem>>, vector<8x12xf32>
    %c20 = arith.constant 20 : index
    %c0_152 = arith.constant 0 : index
    %c0_153 = arith.constant 0 : index
    %149 = vector.load %arg8[%c20, %c0_152, %c0_153] : memref<30x12x96xf32, #tpu.memory_space<vmem>>, vector<1x12x96xf32>
    %150 = vector.shape_cast %149 : vector<1x12x96xf32> to vector<12x96xf32>
    %cst_154 = arith.constant dense<0.000000e+00> : vector<8x96xf32>
    %151 = tpu.matmul %148, %150, %cst_154 {dimension_numbers = #tpu.dot_dimension_numbers<[1], [0], [0], [1], [0, 0, 1, 1], [], []>} : vector<8x12xf32>, vector<12x96xf32>, vector<8x96xf32> -> vector<8x96xf32>
    %152 = arith.addf %147, %151 : vector<8x96xf32>
    %c1_155 = arith.constant 1 : index
    %c48_156 = arith.constant 48 : index
    %153 = vector.load %arg23[%c1_155, %c48_156] : memref<12x72xf32, #tpu.memory_space<vmem>>, vector<8x12xf32>
    %c21 = arith.constant 21 : index
    %c0_157 = arith.constant 0 : index
    %c0_158 = arith.constant 0 : index
    %154 = vector.load %arg8[%c21, %c0_157, %c0_158] : memref<30x12x96xf32, #tpu.memory_space<vmem>>, vector<1x12x96xf32>
    %155 = vector.shape_cast %154 : vector<1x12x96xf32> to vector<12x96xf32>
    %cst_159 = arith.constant dense<0.000000e+00> : vector<8x96xf32>
    %156 = tpu.matmul %153, %155, %cst_159 {dimension_numbers = #tpu.dot_dimension_numbers<[1], [0], [0], [1], [0, 0, 1, 1], [], []>} : vector<8x12xf32>, vector<12x96xf32>, vector<8x96xf32> -> vector<8x96xf32>
    %157 = arith.addf %152, %156 : vector<8x96xf32>
    %c2_160 = arith.constant 2 : index
    %c48_161 = arith.constant 48 : index
    %158 = vector.load %arg23[%c2_160, %c48_161] : memref<12x72xf32, #tpu.memory_space<vmem>>, vector<8x12xf32>
    %c22 = arith.constant 22 : index
    %c0_162 = arith.constant 0 : index
    %c0_163 = arith.constant 0 : index
    %159 = vector.load %arg8[%c22, %c0_162, %c0_163] : memref<30x12x96xf32, #tpu.memory_space<vmem>>, vector<1x12x96xf32>
    %160 = vector.shape_cast %159 : vector<1x12x96xf32> to vector<12x96xf32>
    %cst_164 = arith.constant dense<0.000000e+00> : vector<8x96xf32>
    %161 = tpu.matmul %158, %160, %cst_164 {dimension_numbers = #tpu.dot_dimension_numbers<[1], [0], [0], [1], [0, 0, 1, 1], [], []>} : vector<8x12xf32>, vector<12x96xf32>, vector<8x96xf32> -> vector<8x96xf32>
    %162 = arith.addf %157, %161 : vector<8x96xf32>
    %c3_165 = arith.constant 3 : index
    %c48_166 = arith.constant 48 : index
    %163 = vector.load %arg23[%c3_165, %c48_166] : memref<12x72xf32, #tpu.memory_space<vmem>>, vector<8x12xf32>
    %c23 = arith.constant 23 : index
    %c0_167 = arith.constant 0 : index
    %c0_168 = arith.constant 0 : index
    %164 = vector.load %arg8[%c23, %c0_167, %c0_168] : memref<30x12x96xf32, #tpu.memory_space<vmem>>, vector<1x12x96xf32>
    %165 = vector.shape_cast %164 : vector<1x12x96xf32> to vector<12x96xf32>
    %cst_169 = arith.constant dense<0.000000e+00> : vector<8x96xf32>
    %166 = tpu.matmul %163, %165, %cst_169 {dimension_numbers = #tpu.dot_dimension_numbers<[1], [0], [0], [1], [0, 0, 1, 1], [], []>} : vector<8x12xf32>, vector<12x96xf32>, vector<8x96xf32> -> vector<8x96xf32>
    %167 = arith.addf %162, %166 : vector<8x96xf32>
    %c4_170 = arith.constant 4 : index
    %c48_171 = arith.constant 48 : index
    %168 = vector.load %arg23[%c4_170, %c48_171] : memref<12x72xf32, #tpu.memory_space<vmem>>, vector<8x12xf32>
    %c24_172 = arith.constant 24 : index
    %c0_173 = arith.constant 0 : index
    %c0_174 = arith.constant 0 : index
    %169 = vector.load %arg8[%c24_172, %c0_173, %c0_174] : memref<30x12x96xf32, #tpu.memory_space<vmem>>, vector<1x12x96xf32>
    %170 = vector.shape_cast %169 : vector<1x12x96xf32> to vector<12x96xf32>
    %cst_175 = arith.constant dense<0.000000e+00> : vector<8x96xf32>
    %171 = tpu.matmul %168, %170, %cst_175 {dimension_numbers = #tpu.dot_dimension_numbers<[1], [0], [0], [1], [0, 0, 1, 1], [], []>} : vector<8x12xf32>, vector<12x96xf32>, vector<8x96xf32> -> vector<8x96xf32>
    %172 = arith.addf %167, %171 : vector<8x96xf32>
    %c0_176 = arith.constant 0 : index
    %c60 = arith.constant 60 : index
    %173 = vector.load %arg23[%c0_176, %c60] : memref<12x72xf32, #tpu.memory_space<vmem>>, vector<8x12xf32>
    %c25 = arith.constant 25 : index
    %c0_177 = arith.constant 0 : index
    %c0_178 = arith.constant 0 : index
    %174 = vector.load %arg8[%c25, %c0_177, %c0_178] : memref<30x12x96xf32, #tpu.memory_space<vmem>>, vector<1x12x96xf32>
    %175 = vector.shape_cast %174 : vector<1x12x96xf32> to vector<12x96xf32>
    %cst_179 = arith.constant dense<0.000000e+00> : vector<8x96xf32>
    %176 = tpu.matmul %173, %175, %cst_179 {dimension_numbers = #tpu.dot_dimension_numbers<[1], [0], [0], [1], [0, 0, 1, 1], [], []>} : vector<8x12xf32>, vector<12x96xf32>, vector<8x96xf32> -> vector<8x96xf32>
    %177 = arith.addf %172, %176 : vector<8x96xf32>
    %c1_180 = arith.constant 1 : index
    %c60_181 = arith.constant 60 : index
    %178 = vector.load %arg23[%c1_180, %c60_181] : memref<12x72xf32, #tpu.memory_space<vmem>>, vector<8x12xf32>
    %c26 = arith.constant 26 : index
    %c0_182 = arith.constant 0 : index
    %c0_183 = arith.constant 0 : index
    %179 = vector.load %arg8[%c26, %c0_182, %c0_183] : memref<30x12x96xf32, #tpu.memory_space<vmem>>, vector<1x12x96xf32>
    %180 = vector.shape_cast %179 : vector<1x12x96xf32> to vector<12x96xf32>
    %cst_184 = arith.constant dense<0.000000e+00> : vector<8x96xf32>
    %181 = tpu.matmul %178, %180, %cst_184 {dimension_numbers = #tpu.dot_dimension_numbers<[1], [0], [0], [1], [0, 0, 1, 1], [], []>} : vector<8x12xf32>, vector<12x96xf32>, vector<8x96xf32> -> vector<8x96xf32>
    %182 = arith.addf %177, %181 : vector<8x96xf32>
    %c2_185 = arith.constant 2 : index
    %c60_186 = arith.constant 60 : index
    %183 = vector.load %arg23[%c2_185, %c60_186] : memref<12x72xf32, #tpu.memory_space<vmem>>, vector<8x12xf32>
    %c27 = arith.constant 27 : index
    %c0_187 = arith.constant 0 : index
    %c0_188 = arith.constant 0 : index
    %184 = vector.load %arg8[%c27, %c0_187, %c0_188] : memref<30x12x96xf32, #tpu.memory_space<vmem>>, vector<1x12x96xf32>
    %185 = vector.shape_cast %184 : vector<1x12x96xf32> to vector<12x96xf32>
    %cst_189 = arith.constant dense<0.000000e+00> : vector<8x96xf32>
    %186 = tpu.matmul %183, %185, %cst_189 {dimension_numbers = #tpu.dot_dimension_numbers<[1], [0], [0], [1], [0, 0, 1, 1], [], []>} : vector<8x12xf32>, vector<12x96xf32>, vector<8x96xf32> -> vector<8x96xf32>
    %187 = arith.addf %182, %186 : vector<8x96xf32>
    %c3_190 = arith.constant 3 : index
    %c60_191 = arith.constant 60 : index
    %188 = vector.load %arg23[%c3_190, %c60_191] : memref<12x72xf32, #tpu.memory_space<vmem>>, vector<8x12xf32>
    %c28 = arith.constant 28 : index
    %c0_192 = arith.constant 0 : index
    %c0_193 = arith.constant 0 : index
    %189 = vector.load %arg8[%c28, %c0_192, %c0_193] : memref<30x12x96xf32, #tpu.memory_space<vmem>>, vector<1x12x96xf32>
    %190 = vector.shape_cast %189 : vector<1x12x96xf32> to vector<12x96xf32>
    %cst_194 = arith.constant dense<0.000000e+00> : vector<8x96xf32>
    %191 = tpu.matmul %188, %190, %cst_194 {dimension_numbers = #tpu.dot_dimension_numbers<[1], [0], [0], [1], [0, 0, 1, 1], [], []>} : vector<8x12xf32>, vector<12x96xf32>, vector<8x96xf32> -> vector<8x96xf32>
    %192 = arith.addf %187, %191 : vector<8x96xf32>
    %c4_195 = arith.constant 4 : index
    %c60_196 = arith.constant 60 : index
    %193 = vector.load %arg23[%c4_195, %c60_196] : memref<12x72xf32, #tpu.memory_space<vmem>>, vector<8x12xf32>
    %c29 = arith.constant 29 : index
    %c0_197 = arith.constant 0 : index
    %c0_198 = arith.constant 0 : index
    %194 = vector.load %arg8[%c29, %c0_197, %c0_198] : memref<30x12x96xf32, #tpu.memory_space<vmem>>, vector<1x12x96xf32>
    %195 = vector.shape_cast %194 : vector<1x12x96xf32> to vector<12x96xf32>
    %cst_199 = arith.constant dense<0.000000e+00> : vector<8x96xf32>
    %196 = tpu.matmul %193, %195, %cst_199 {dimension_numbers = #tpu.dot_dimension_numbers<[1], [0], [0], [1], [0, 0, 1, 1], [], []>} : vector<8x12xf32>, vector<12x96xf32>, vector<8x96xf32> -> vector<8x96xf32>
    %197 = arith.addf %192, %196 : vector<8x96xf32>
    %c0_200 = arith.constant 0 : index
    %c0_201 = arith.constant 0 : index
    %198 = vector.load %arg9[%c0_200, %c0_201] : memref<1x96xf32, #tpu.memory_space<vmem>>, vector<1x96xf32>
    %199 = vector.broadcast %198 : vector<1x96xf32> to vector<8x96xf32>
    %200 = arith.addf %197, %199 : vector<8x96xf32>
    %cst_202 = arith.constant 0.000000e+00 : f32
    %201 = vector.broadcast %cst_202 : f32 to vector<8x96xf32>
    %202 = arith.maximumf %200, %201 : vector<8x96xf32>
    %c0_203 = arith.constant 0 : index
    %c0_204 = arith.constant 0 : index
    %203 = vector.load %arg10[%c0_203, %c0_204] : memref<96x48xf32, #tpu.memory_space<vmem>>, vector<96x48xf32>
    %cst_205 = arith.constant dense<0.000000e+00> : vector<8x48xf32>
    %204 = tpu.matmul %202, %203, %cst_205 {dimension_numbers = #tpu.dot_dimension_numbers<[1], [0], [0], [1], [0, 0, 1, 1], [], []>} : vector<8x96xf32>, vector<96x48xf32>, vector<8x48xf32> -> vector<8x48xf32>
    %c0_206 = arith.constant 0 : index
    %c0_207 = arith.constant 0 : index
    %205 = vector.load %arg11[%c0_206, %c0_207] : memref<96x48xf32, #tpu.memory_space<vmem>>, vector<96x48xf32>
    %cst_208 = arith.constant dense<0.000000e+00> : vector<8x48xf32>
    %206 = tpu.matmul %202, %205, %cst_208 {dimension_numbers = #tpu.dot_dimension_numbers<[1], [0], [0], [1], [0, 0, 1, 1], [], []>} : vector<8x96xf32>, vector<96x48xf32>, vector<8x48xf32> -> vector<8x48xf32>
    %207 = arith.maximumf %204, %206 : vector<8x48xf32>
    %c0_209 = arith.constant 0 : index
    %c0_210 = arith.constant 0 : index
    %208 = vector.load %arg12[%c0_209, %c0_210] : memref<4x8xf32, #tpu.memory_space<vmem>>, vector<4x8xf32>
    %cst_211 = arith.constant dense<0.000000e+00> : vector<4x48xf32>
    %209 = tpu.matmul %208, %207, %cst_211 {dimension_numbers = #tpu.dot_dimension_numbers<[1], [0], [0], [1], [0, 0, 1, 1], [], []>} : vector<4x8xf32>, vector<8x48xf32>, vector<4x48xf32> -> vector<4x48xf32>
    %c0_212 = arith.constant 0 : index
    %c0_213 = arith.constant 0 : index
    %210 = vector.load %arg13[%c0_212, %c0_213] : memref<4x8xf32, #tpu.memory_space<vmem>>, vector<4x8xf32>
    %cst_214 = arith.constant dense<0.000000e+00> : vector<4x48xf32>
    %211 = tpu.matmul %210, %207, %cst_214 {dimension_numbers = #tpu.dot_dimension_numbers<[1], [0], [0], [1], [0, 0, 1, 1], [], []>} : vector<4x8xf32>, vector<8x48xf32>, vector<4x48xf32> -> vector<4x48xf32>
    %212 = arith.maximumf %209, %211 : vector<4x48xf32>
    %c0_215 = arith.constant 0 : index
    %c0_216 = arith.constant 0 : index
    %213 = vector.load %arg14[%c0_215, %c0_216] : memref<48x192xf32, #tpu.memory_space<vmem>>, vector<48x192xf32>
    %cst_217 = arith.constant dense<0.000000e+00> : vector<4x192xf32>
    %214 = tpu.matmul %212, %213, %cst_217 {dimension_numbers = #tpu.dot_dimension_numbers<[1], [0], [0], [1], [0, 0, 1, 1], [], []>} : vector<4x48xf32>, vector<48x192xf32>, vector<4x192xf32> -> vector<4x192xf32>
    %c0_218 = arith.constant 0 : index
    %c0_219 = arith.constant 0 : index
    %215 = vector.load %arg15[%c0_218, %c0_219] : memref<4x192xf32, #tpu.memory_space<vmem>>, vector<4x192xf32>
    %216 = arith.mulf %215, %214 : vector<4x192xf32>
    %cst_220 = arith.constant dense<0.000000e+00> : vector<192xf32>
    %217 = vector.multi_reduction <add>, %216, %cst_220 [0] : vector<4x192xf32> to vector<192xf32>
    %218 = vector.shape_cast %217 : vector<192xf32> to vector<1x192xf32>
    %c0_221 = arith.constant 0 : index
    %c0_222 = arith.constant 0 : index
    %219 = vector.load %arg16[%c0_221, %c0_222] : memref<192x32xf32, #tpu.memory_space<vmem>>, vector<192x32xf32>
    %cst_223 = arith.constant dense<0.000000e+00> : vector<1x32xf32>
    %220 = tpu.matmul %218, %219, %cst_223 {dimension_numbers = #tpu.dot_dimension_numbers<[1], [0], [0], [1], [0, 0, 1, 1], [], []>} : vector<1x192xf32>, vector<192x32xf32>, vector<1x32xf32> -> vector<1x32xf32>
    %c0_224 = arith.constant 0 : index
    %c0_225 = arith.constant 0 : index
    %221 = vector.load %arg17[%c0_224, %c0_225] : memref<1x32xf32, #tpu.memory_space<vmem>>, vector<1x32xf32>
    %222 = arith.addf %220, %221 : vector<1x32xf32>
    %cst_226 = arith.constant 0.000000e+00 : f32
    %223 = vector.broadcast %cst_226 : f32 to vector<1x32xf32>
    %224 = arith.maximumf %222, %223 : vector<1x32xf32>
    %c0_227 = arith.constant 0 : index
    %c0_228 = arith.constant 0 : index
    %225 = vector.load %arg18[%c0_227, %c0_228] : memref<32x32xf32, #tpu.memory_space<vmem>>, vector<32x32xf32>
    %cst_229 = arith.constant dense<0.000000e+00> : vector<1x32xf32>
    %226 = tpu.matmul %224, %225, %cst_229 {dimension_numbers = #tpu.dot_dimension_numbers<[1], [0], [0], [1], [0, 0, 1, 1], [], []>} : vector<1x32xf32>, vector<32x32xf32>, vector<1x32xf32> -> vector<1x32xf32>
    %c0_230 = arith.constant 0 : index
    %c0_231 = arith.constant 0 : index
    %227 = vector.load %arg19[%c0_230, %c0_231] : memref<1x32xf32, #tpu.memory_space<vmem>>, vector<1x32xf32>
    %228 = arith.addf %226, %227 : vector<1x32xf32>
    %cst_232 = arith.constant 0.000000e+00 : f32
    %229 = vector.broadcast %cst_232 : f32 to vector<1x32xf32>
    %230 = arith.maximumf %228, %229 : vector<1x32xf32>
    %c0_233 = arith.constant 0 : index
    %c0_234 = arith.constant 0 : index
    %231 = vector.load %arg20[%c0_233, %c0_234] : memref<32x10xf32, #tpu.memory_space<vmem>>, vector<32x10xf32>
    %cst_235 = arith.constant dense<0.000000e+00> : vector<1x10xf32>
    %232 = tpu.matmul %230, %231, %cst_235 {dimension_numbers = #tpu.dot_dimension_numbers<[1], [0], [0], [1], [0, 0, 1, 1], [], []>} : vector<1x32xf32>, vector<32x10xf32>, vector<1x10xf32> -> vector<1x10xf32>
    %c0_236 = arith.constant 0 : index
    %c0_237 = arith.constant 0 : index
    %233 = vector.load %arg21[%c0_236, %c0_237] : memref<1x10xf32, #tpu.memory_space<vmem>>, vector<1x10xf32>
    %234 = arith.addf %232, %233 : vector<1x10xf32>
    %c0_238 = arith.constant 0 : index
    %c0_239 = arith.constant 0 : index
    %c0_240 = arith.constant 0 : index
    %235 = vector.load %arg22[%c0_238, %c0_239, %c0_240] : memref<1x1x10xf32, #tpu.memory_space<vmem>>, vector<1x1x10xf32>
    %236 = vector.shape_cast %235 : vector<1x1x10xf32> to vector<1x10xf32>
    %237 = vector.shape_cast %234 : vector<1x10xf32> to vector<1x1x10xf32>
    tpu.vector_store %arg22[%c0_238, %c0_239, %c0_240], %237 {strides = array<i32>} : memref<1x1x10xf32, #tpu.memory_space<vmem>>, vector<1x1x10xf32>,
    return
  }
  func.func @transform_0(%arg0: i32) -> (i32, i32, i32) {
    %c0_i32 = arith.constant 0 : i32
    %c0_i32_0 = arith.constant 0 : i32
    %c0_i32_1 = arith.constant 0 : i32
    return %arg0, %c0_i32, %c0_i32_0 : i32, i32, i32
  }
  func.func @transform_1(%arg0: i32) -> (i32, i32, i32) {
    %c0_i32 = arith.constant 0 : i32
    %c0_i32_0 = arith.constant 0 : i32
    %c0_i32_1 = arith.constant 0 : i32
    %c0_i32_2 = arith.constant 0 : i32
    return %c0_i32, %c0_i32_0, %c0_i32_1 : i32, i32, i32
  }
  func.func @transform_2(%arg0: i32) -> (i32, i32) {
    %c0_i32 = arith.constant 0 : i32
    %c0_i32_0 = arith.constant 0 : i32
    %c0_i32_1 = arith.constant 0 : i32
    return %c0_i32, %c0_i32_0 : i32, i32
  }
  func.func @transform_3(%arg0: i32) -> (i32, i32) {
    %c0_i32 = arith.constant 0 : i32
    %c0_i32_0 = arith.constant 0 : i32
    %c0_i32_1 = arith.constant 0 : i32
    return %c0_i32, %c0_i32_0 : i32, i32
  }
  func.func @transform_4(%arg0: i32) -> (i32, i32) {
    %c0_i32 = arith.constant 0 : i32
    %c0_i32_0 = arith.constant 0 : i32
    %c0_i32_1 = arith.constant 0 : i32
    return %c0_i32, %c0_i32_0 : i32, i32
  }
  func.func @transform_5(%arg0: i32) -> (i32, i32) {
    %c0_i32 = arith.constant 0 : i32
    %c0_i32_0 = arith.constant 0 : i32
    %c0_i32_1 = arith.constant 0 : i32
    return %c0_i32, %c0_i32_0 : i32, i32
  }
  func.func @transform_6(%arg0: i32) -> (i32, i32) {
    %c0_i32 = arith.constant 0 : i32
    %c0_i32_0 = arith.constant 0 : i32
    %c0_i32_1 = arith.constant 0 : i32
    return %c0_i32, %c0_i32_0 : i32, i32
  }
  func.func @transform_7(%arg0: i32) -> (i32, i32, i32) {
    %c0_i32 = arith.constant 0 : i32
    %c0_i32_0 = arith.constant 0 : i32
    %c0_i32_1 = arith.constant 0 : i32
    %c0_i32_2 = arith.constant 0 : i32
    return %c0_i32, %c0_i32_0, %c0_i32_1 : i32, i32, i32
  }
  func.func @transform_8(%arg0: i32) -> (i32, i32) {
    %c0_i32 = arith.constant 0 : i32
    %c0_i32_0 = arith.constant 0 : i32
    %c0_i32_1 = arith.constant 0 : i32
    return %c0_i32, %c0_i32_0 : i32, i32
  }
  func.func @transform_9(%arg0: i32) -> (i32, i32) {
    %c0_i32 = arith.constant 0 : i32
    %c0_i32_0 = arith.constant 0 : i32
    %c0_i32_1 = arith.constant 0 : i32
    return %c0_i32, %c0_i32_0 : i32, i32
  }
  func.func @transform_10(%arg0: i32) -> (i32, i32) {
    %c0_i32 = arith.constant 0 : i32
    %c0_i32_0 = arith.constant 0 : i32
    %c0_i32_1 = arith.constant 0 : i32
    return %c0_i32, %c0_i32_0 : i32, i32
  }
  func.func @transform_11(%arg0: i32) -> (i32, i32) {
    %c0_i32 = arith.constant 0 : i32
    %c0_i32_0 = arith.constant 0 : i32
    %c0_i32_1 = arith.constant 0 : i32
    return %c0_i32, %c0_i32_0 : i32, i32
  }
  func.func @transform_12(%arg0: i32) -> (i32, i32) {
    %c0_i32 = arith.constant 0 : i32
    %c0_i32_0 = arith.constant 0 : i32
    %c0_i32_1 = arith.constant 0 : i32
    return %c0_i32, %c0_i32_0 : i32, i32
  }
  func.func @transform_13(%arg0: i32) -> (i32, i32) {
    %c0_i32 = arith.constant 0 : i32
    %c0_i32_0 = arith.constant 0 : i32
    %c0_i32_1 = arith.constant 0 : i32
    return %c0_i32, %c0_i32_0 : i32, i32
  }
  func.func @transform_14(%arg0: i32) -> (i32, i32) {
    %c0_i32 = arith.constant 0 : i32
    %c0_i32_0 = arith.constant 0 : i32
    %c0_i32_1 = arith.constant 0 : i32
    return %c0_i32, %c0_i32_0 : i32, i32
  }
  func.func @transform_15(%arg0: i32) -> (i32, i32) {
    %c0_i32 = arith.constant 0 : i32
    %c0_i32_0 = arith.constant 0 : i32
    %c0_i32_1 = arith.constant 0 : i32
    return %c0_i32, %c0_i32_0 : i32, i32
  }
  func.func @transform_16(%arg0: i32) -> (i32, i32) {
    %c0_i32 = arith.constant 0 : i32
    %c0_i32_0 = arith.constant 0 : i32
    %c0_i32_1 = arith.constant 0 : i32
    return %c0_i32, %c0_i32_0 : i32, i32
  }
  func.func @transform_17(%arg0: i32) -> (i32, i32) {
    %c0_i32 = arith.constant 0 : i32
    %c0_i32_0 = arith.constant 0 : i32
    %c0_i32_1 = arith.constant 0 : i32
    return %c0_i32, %c0_i32_0 : i32, i32
  }
  func.func @transform_18(%arg0: i32) -> (i32, i32) {
    %c0_i32 = arith.constant 0 : i32
    %c0_i32_0 = arith.constant 0 : i32
    %c0_i32_1 = arith.constant 0 : i32
    return %c0_i32, %c0_i32_0 : i32, i32
  }
  func.func @transform_19(%arg0: i32) -> (i32, i32) {
    %c0_i32 = arith.constant 0 : i32
    %c0_i32_0 = arith.constant 0 : i32
    %c0_i32_1 = arith.constant 0 : i32
    return %c0_i32, %c0_i32_0 : i32, i32
  }
  func.func @transform_20(%arg0: i32) -> (i32, i32) {
    %c0_i32 = arith.constant 0 : i32
    %c0_i32_0 = arith.constant 0 : i32
    %c0_i32_1 = arith.constant 0 : i32
    return %c0_i32, %c0_i32_0 : i32, i32
  }
  func.func @transform_21(%arg0: i32) -> (i32, i32, i32) {
    %c0_i32 = arith.constant 0 : i32
    %c0_i32_0 = arith.constant 0 : i32
    %c0_i32_1 = arith.constant 0 : i32
    return %arg0, %c0_i32, %c0_i32_0 : i32, i32, i32
  }
}

</mosaic_0001>

<bundles_post_ra>
// kernel: tpu_custom_call.1
= control target key start
LH: loop header
LB: loop body
LE: loop exit
PB: predicated region body
PF: predicated region fallthrough
CT: control target
= control target key end

     0   :  { %s7151_s0 = inlined_call_operand.vmem [shape: f32[2,28,28], index: 0, kind: input, shape index: {}]   ;;  %s7152_s1 = inlined_call_operand.vmem [shape: f32[5,28,144], index: 1, kind: input, shape index: {}]   ;;  %s7153_s2 = inlined_call_operand.vmem [shape: f32[1,144], index: 2, kind: input, shape index: {}]   ;;  %s7154_s3 = inlined_call_operand.vmem [shape: f32[144,72], index: 3, kind: input, shape index: {}]   ;;  %s7155_s4 = inlined_call_operand.vmem [shape: f32[144,72], index: 4, kind: input, shape index: {}]   ;;  %s7156_s5 = inlined_call_operand.vmem [shape: f32[12,24], index: 5, kind: input, shape index: {}]   ;;  %s7157_s6 = inlined_call_operand.vmem [shape: f32[12,24], index: 6, kind: input, shape index: {}]   ;;  %s7158_s7 = inlined_call_operand.vmem [shape: f32[30,12,96], index: 7, kind: input, shape index: {}]   ;;  %s7159_s8 = inlined_call_operand.vmem [shape: f32[1,96], index: 8, kind: input, shape index: {}]   ;;  %s7160_s9 = inlined_call_operand.vmem [shape: f32[96,48], index: 9, kind: input, shape index: {}]   ;;  %s7161_s10 = inlined_call_operand.vmem [shape: f32[96,48], index: 10, kind: input, shape index: {}]   ;;  %s7162_s11 = inlined_call_operand.vmem [shape: f32[4,8], index: 11, kind: input, shape index: {}]   ;;  %s7163_s12 = inlined_call_operand.vmem [shape: f32[4,8], index: 12, kind: input, shape index: {}]   ;;  %s7164_s13 = inlined_call_operand.vmem [shape: f32[48,192], index: 13, kind: input, shape index: {}]   ;;  %s7165_s14 = inlined_call_operand.vmem [shape: f32[4,192], index: 14, kind: input, shape index: {}]   ;;  %s7166_s15 = inlined_call_operand.vmem [shape: f32[192,32], index: 15, kind: input, shape index: {}]   ;;  %s7167_s16 = inlined_call_operand.vmem [shape: f32[1,32], index: 16, kind: input, shape index: {}]   ;;  %s7168_s17 = inlined_call_operand.vmem [shape: f32[32,32], index: 17, kind: input, shape index: {}]   ;;  %s7169_s18 = inlined_call_operand.vmem [shape: f32[1,32], index: 18, kind: input, shape index: {}]   ;;  %s7170_s19 = inlined_call_operand.vmem [shape: f32[32,10], index: 19, kind: input, shape index: {}]   ;;  %s7171_s20 = inlined_call_operand.vmem [shape: f32[1,10], index: 20, kind: input, shape index: {}]   ;;  %s7172_s21 = inlined_call_operand.hbm [shape: f32[2,1,10], index: 21, kind: output, shape index: {}]  }
   0x1   :  { %7184 = sst [smem:[#allocation12_spill]] %s7151_s0 }
   0x2   :  { %7185 = sst [smem:[#allocation13_spill]] %s7152_s1 }
   0x3   :  { %7186 = sst [smem:[#allocation14_spill]] %s7153_s2 }
   0x4   :  { %7187 = sst [smem:[#allocation15_spill]] %s7154_s3 }
   0x5   :  { %7188 = sst [smem:[#allocation16_spill]] %s7155_s4 }
   0x6   :  { %7189 = sst [smem:[#allocation17_spill]] %s7156_s5 }
   0x7   :  { %7190 = sst [smem:[#allocation18_spill]] %s7157_s6 }
   0x8   :  { %7191 = sst [smem:[#allocation19_spill]] %s7158_s7 }
   0x9   :  { %7192 = sst [smem:[#allocation20_spill]] %s7159_s8 }
   0xa   :  { %7193 = sst [smem:[#allocation21_spill]] %s7171_s20 }
   0xb   :  { %7194 = sst [smem:[#allocation22_spill]] %s7172_s21 }
   0xc   :  { %26 = vsyncpa [#allocation4], 0 }
   0xd   :  { %28 = vsyncpa [#allocation4 + $0x1], 0  ;;  %s6066_s2 = smov 0   ;;  %s6068_s25 = smov 0  }
   0xe   :  { %s6070_s26 = smov 0   ;;  %s6072_s27 = smov 0  }
   0xf LB: > { %7195 = sst [smem:[#allocation6_spill]] %s5932_s2  ;;  %s6087_s3 = sadd.s32 4294967295, %s5944_s27   ;;  %s5944_s27 = sphi %s6072_s27, %s7220_s27   ;;  %s5940_s26 = sphi %s6070_s26, %s7222_s26   ;;  %s5936_s25 = sphi %s6068_s25, %s7224_s25   ;;  %s5932_s2 = sphi %s6066_s2, %s7223_s2  }
  0x10   : > { %7196 = sst [smem:[#allocation7_spill]] %s5940_s26  ;;  %s4824_s28 = sadd.s32 4294967294, %s5944_s27  }
  0x11   : > { %7197 = sst [smem:[#allocation8_spill]] %s5944_s27  ;;  %s6091_s29 = sadd.s32 1, %s5944_s27  }
  0x12   : > { %7198 = sst [smem:[#allocation9_spill]] %s6091_s29  ;;  %s487_s0 = sadd.s32 1, %s5940_s26 }
  0x13   : > { %s484_s4 = ssub.s32 %s5944_s27, %s6091_s29  ;;  %p497_p0 = scmp.ne.s32.totalorder %s5940_s26, %s5936_s25 }
  0x14   : > { %p485_p1 = scmp.eq.s32.totalorder %s484_s4, 0  ;;  %p498_p2 = scmp.eq.s32.totalorder %s6087_s3, 1 }
  0x15   : > { %p503_p3 = scmp.ne.s32.totalorder %s5936_s25, %s5932_s2  ;;  %p504_p4 = scmp.eq.s32.totalorder %s4824_s28, 1 }
  0x16   : > { %s6102_s30 = scalar_select %p485_p1, %s5940_s26, %s487_s0  }
  0x17   : > { %p6104_p5 = por %p498_p2, %p497_p0  ;;  %p6108_p6 = por %p504_p4, %p503_p3 }
  0x18   : > { %7199 = sst [smem:[#allocation10_spill]] %s6102_s30  ;;  %p4827_p7 = scmp.ge.s32.totalorder %s5944_s27, 1 }
  0x19   : > { %s7201_s22 = scalar_select %p6108_p6, 1, 0 }
  0x1a   : > { %p590_p8 = scmp.lt.s32.totalorder %s5944_s27, 3 }
  0x1b   : > { %7202 = sst [smem:[#allocation11_spill]] %s7201_s22 }
  0x1c   : > { %p591_p9 = pnand %p4827_p7, %p590_p8 }
  0x1d   : > { %s7203_s24 = sld [smem:[#allocation13_spill]] (!%p591_p9)  ;;  %vm687_vm0 = vcmask (!%p591_p9), 1043456   ;;  %v5946_v7 = vmov (!%p591_p9), 0.0   ;;  %p649_p10 = scmp.lt.s32.totalorder (!%p591_p9), %s6087_s3, 1  ;;  %vm5947_vm1 = vmmov (!%p591_p9), 1   ;;  %vm677_vm3 = vcmask (!%p591_p9), 228352  }
  0x1e   : > { %594 = sbr.rel (%p591_p9) target bundleno = 2500 (0x9c4), region = 104  ;;  %856 = vmatprep.mubr.f32.mxu0 (!%p591_p9), %v5946_v7  ;;  %758 = vmatprep.mubr.f32.mxu1 (!%p591_p9), %v5946_v7  ;;  %vm6136_vm2 = vmpackc.low (!%p591_p9), %vm687_vm0, %vm5947_vm1  ;;  %s7206_s27 = sld [smem:[#allocation12_spill]] (!%p591_p9)  ;;  %v5948_v53 = vmov (!%p591_p9), 0.0|0.0   ;;  %vm1265_vm4 = vcmask (!%p591_p9), 130048   ;;  %vm1458_vm5 = vcmask (!%p591_p9), 195584   ;;  %vm5949_vm6 = vmmov (!%p591_p9), 0  }
  0x1f   : > { %s7207_s23 = sld [smem:[#allocation15_spill]] (!%p591_p9)  ;;  %s7209_s21 = sld [smem:[#allocation16_spill]] (!%p591_p9)  ;;  %vm1627_vm7 = vcmask (!%p591_p9), 584704   ;;  %vm1625_vm8 = vcmask (!%p591_p9), 588800   ;;  %vm1636_vm9 = vcmask (!%p591_p9), 97280   ;;  %vm4078_vm10 = vcmask (!%p591_p9), 785408  }
  0x20   : > { %s7210_s29 = sld [smem:[#allocation17_spill]] (!%p591_p9)  ;;  %s7211_s6 = sld [smem:[#allocation18_spill]] (!%p591_p9)  ;;  %vm4236_vm11 = vcmask (!%p591_p9), 64512   ;;  %vm4397_vm12 = vcmask (!%p591_p9), 392192   ;;  %vm4488_vm13 = vcmask (!%p591_p9), 519168   ;;  %vm4521_vm14 = vcmask (!%p591_p9), 523264  }
  0x21   : > { %s7212_s7 = sld [smem:[#allocation19_spill]] (!%p591_p9)  ;;  %s5950_s28 = smov (!%p591_p9), 116   ;;  %vm4601_vm15 = vcmask (!%p591_p9), 261120  }
  0x22   : > { %s5953_s2 = smov (!%p591_p9), 80   ;;  %s5954_s26 = smov (!%p591_p9), 68  }
  0x23   : > { %v658_v0 = vld [vmem:[%s7203_s24 + $0x8] sm:$0xff] (!%p591_p9)  ;;  %v660_v1 = vld [vmem:[%s7203_s24 + $0x18] sm:$0xff] (!%p591_p9)  ;;  %v657_v2 = vld [vmem:[%s7203_s24] sm:$0xff] (!%p591_p9)  ;;  %s7213_s8 = sld [smem:[#allocation20_spill]] (!%p591_p9)  ;;  %s647_s20 = sand.u32 (!%p591_p9), 1, %s5936_s25  }
  0x24   : > { %v5492_v3 = vpack.c.bf16 (!%p591_p9), %v660_v1, %v658_v0  ;;  %v659_v4 = vld [vmem:[%s7203_s24 + $0x10] sm:$0xff] (!%p591_p9)  ;;  %v662_v5 = vld [vmem:[%s7203_s24 + $0x28] sm:$0xff] (!%p591_p9)  ;;  %v664_v6 = vld [vmem:[%s7203_s24 + $0x38] sm:$0xf] (!%p591_p9)  ;;  %s7214_s0 = sld [smem:[#allocation21_spill]] (!%p591_p9)  ;;  %s4757_s30 = scalar_lea.sflag (!%p591_p9), [#allocation4], %s647_s20 }
  0x25   : > { %v5494_v8 = vpack.c.bf16 %v659_v4, %v657_v2  ;;  %v5496_v10 = vpack.c.bf16 %v664_v6, %v662_v5  ;;  %v661_v11 = vld [vmem:[%s7203_s24 + $0x20] sm:$0xff]  ;;  %v663_v12 = vld [vmem:[%s7203_s24 + $0x30] sm:$0xf]  ;;  %s650_s22 = scalar_select %p649_p10, %s6087_s3, 1  ;;  %v4849_v13 = vld [vmem:[%s7203_s24 + $0x88] sm:$0xff] }
  0x26   : > { %5493 = vmatprep.subr.bf16.mxu0 %v5492_v3  ;;  %v4851_v14 = vld [vmem:[%s7203_s24 + $0x98] sm:$0xff]  ;;  %v5499_v15 = vpack.c.bf16 %v663_v12, %v661_v11  ;;  %v4848_v17 = vld [vmem:[%s7203_s24 + $0x80] sm:$0xff]  ;;  %v4850_v18 = vld [vmem:[%s7203_s24 + $0x90] sm:$0xff] }
  0x27   : > { %5495 = vmatpush1.bf16.msra.mxu0 %v5494_v8  ;;  %s5027_s1 = sshll.u32 %s650_s22, 5  ;;  %v5502_v16 = vpack.c.bf16 %v4851_v14, %v4849_v13  ;;  %v4853_v19 = vld [vmem:[%s7203_s24 + $0xa8] sm:$0xff]  ;;  %v4855_v20 = vld [vmem:[%s7203_s24 + $0xb8] sm:$0xf]  ;;  %v5504_v22 = vpack.c.bf16 %v4850_v18, %v4848_v17  ;;  %v4852_v24 = vld [vmem:[%s7203_s24 + $0xa0] sm:$0xff]  ;;  %s7208_s22 = sld [smem:[#allocation14_spill]] }
  0x28   : > { %5498 = vmatprep.subr.msk.bf16.mxu0 %vm6136_vm2, %v5496_v10  ;;  %s6164_s4 = scalar_lea.vmem %s7206_s27, %s5027_s1  ;;  %v5506_v23 = vpack.c.bf16 %v4855_v20, %v4853_v19  ;;  %v4854_v25 = vld [vmem:[%s7203_s24 + $0xb0] sm:$0xf]  ;;  %v4862_v26 = vld [vmem:[%s7203_s24 + $0xc8] sm:$0xff]  ;;  %v4864_v27 = vld [vmem:[%s7203_s24 + $0xd8] sm:$0xff]  ;;  %s5951_s1 = smov 104  }
  0x29   : > { %v654_v21 = vld [vmem:[%s6164_s4] sm:$0xff]  ;;  %v4831_v28 = vld [vmem:[%s7203_s24 + $0x48] sm:$0xff]  ;;  %v4833_v29 = vld [vmem:[%s7203_s24 + $0x58] sm:$0xff]  ;;  %v5509_v33 = vpack.c.bf16 %v4854_v25, %v4852_v24  ;;  %v5512_v36 = vpack.c.bf16 %v4864_v27, %v4862_v26  ;;  %s648_s27 = scalar_lea.vmem [#allocation3], %s647_s20 }
  0x2a   : > { %v4830_v30 = vld [vmem:[%s7203_s24 + $0x40] sm:$0xff]  ;;  %v4832_v31 = vld [vmem:[%s7203_s24 + $0x50] sm:$0xff]  ;;  %v655_v32 = vld [vmem:[%s6164_s4 + $0x8] sm:$0xff]  ;;  %v5482_v34 = vpack.c.bf16 %v4833_v29, %v4831_v28 }
  0x2b   : > { %5501 = vmatpush1.bf16.msk.msra.mxu0 %vm6136_vm2, %v5499_v15  ;;  %v5484_v35 = vpack.c.bf16 %v4832_v31, %v4830_v30  ;;  %v4835_v37 = vld [vmem:[%s7203_s24 + $0x68] sm:$0xff]  ;;  %v4837_v38 = vld [vmem:[%s7203_s24 + $0x78] sm:$0xf]  ;;  %v4834_v39 = vld [vmem:[%s7203_s24 + $0x60] sm:$0xff] }
  0x2c   : > { %5503 = vmatprep.subr.bf16.mxu0 %v5502_v16  ;;  %5483 = vmatprep.subr.bf16.mxu1 %v5482_v34  ;;  %v4836_v40 = vld [vmem:[%s7203_s24 + $0x70] sm:$0xf]  ;;  %v5486_v41 = vpack.c.bf16 %v4837_v38, %v4835_v37  ;;  %v4861_v44 = vld [vmem:[%s7203_s24 + $0xc0] sm:$0xff]  ;;  %v4866_v46 = vld [vmem:[%s7203_s24 + $0xe8] sm:$0xff] }
  0x2d   : > { %5485 = vmatpush1.bf16.msra.mxu1 %v5484_v35  ;;  %v5489_v42 = vpack.c.bf16 %v4836_v40, %v4834_v39  ;;  %v656_v43 = vld [vmem:[%s6164_s4 + $0x10] sm:$0xff]  ;;  %v4868_v47 = vld [vmem:[%s7203_s24 + $0xf8] sm:$0xf]  ;;  %v1247_v48 = vld [vmem:[%s7207_s23] sm:$0xff] }
  0x2e   : > { %4845 = vmatmul.mubr.msk.f32.vlgmr.msra.gmra.mrb[0].mxu0 %vm677_vm3, %v654_v21  ;;  %v4863_v45 = vld [vmem:[%s7203_s24 + $0xd0] sm:$0xff]  ;;  %5488 = vmatprep.subr.msk.bf16.mxu1 %vm6136_vm2, %v5486_v41  ;;  %v665_v49 = vld [vmem:[%s6164_s4 + $0x1] sm:$0xff]  ;;  %v5516_v54 = vpack.c.bf16 %v4868_v47, %v4866_v46  ;;  %v4877_v59 = vld [vmem:[%s7203_s24 + $0x118] sm:$0xff] }
  0x2f   : > { %862 = vmatprep.mubr.f32.mxu0 %v5946_v7  ;;  %5505 = vmatpush1.bf16.msra.mxu0 %v5504_v22  ;;  %v1248_v50 = vld [vmem:[%s7207_s23 + $0x8] sm:$0xff]  ;;  %v5514_v52 = vpack.c.bf16 %v4863_v45, %v4861_v44  ;;  %v4865_v55 = vld [vmem:[%s7203_s24 + $0xe0] sm:$0xff]  ;;  %v4867_v56 = vld [vmem:[%s7203_s24 + $0xf0] sm:$0xf] }
  0x30   : > { %5508 = vmatprep.subr.msk.bf16.mxu0 %vm6136_vm2, %v5506_v23  ;;  %v875_v51 = vld [vmem:[%s6164_s4 + $0x2] sm:$0xff]  ;;  %v5533_v58 = vpack.c.bf16 %v1248_v50, %v1247_v48  ;;  %v1249_v60 = vld [vmem:[%s7207_s23 + $0x10] sm:$0xff]  ;;  %v1250_v61 = vld [vmem:[%s7207_s23 + $0x18] sm:$0xff]  ;;  %v5519_v0 = vpack.c.bf16 %v4867_v56, %v4865_v55 }
  0x31   : > { %5491 = vmatpush1.bf16.msk.msra.mxu1 %vm6136_vm2, %v5489_v42  ;;  %v4875_v57 = vld [vmem:[%s7203_s24 + $0x108] sm:$0xff]  ;;  %v5536_v2 = vpack.c.bf16 %v1250_v61, %v1249_v60  ;;  %v1251_v3 = vld [vmem:[%s7207_s23 + $0x20] sm:$0xff]  ;;  %v667_v5 = vld [vmem:[%s6164_s4 + $0x11] sm:$0xff] }
  0x32   : > { %4846 = vmatmul.mubr.msk.f32.gmra.mrb[2].mxu0 %vm677_vm3, %v655_v32  ;;  %5532 = vmatprep.subr.bf16.mxu1 %v5948_v53  ;;  %v666_v62 = vld [vmem:[%s6164_s4 + $0x9] sm:$0xff]  ;;  %v5522_v1 = vpack.c.bf16 %v4877_v59, %v4875_v57  ;;  %v877_v6 = vld [vmem:[%s6164_s4 + $0x12] sm:$0xff]  ;;  %v4874_v8 = vld [vmem:[%s7203_s24 + $0x100] sm:$0xff] }
  0x33   : > { %868 = vmatprep.mubr.f32.mxu0 %v5946_v7  ;;  %5511 = vmatpush1.bf16.msk.msra.mxu0 %vm6136_vm2, %v5509_v33  ;;  %v876_v63 = vld [vmem:[%s6164_s4 + $0xa] sm:$0xff]  ;;  %v4881_v13 = vld [vmem:[%s7203_s24 + $0x138] sm:$0xf]  ;;  %v4878_v19 = vld [vmem:[%s7203_s24 + $0x120] sm:$0xff] }
  0x34   : > { %5513 = vmatprep.subr.bf16.mxu0 %v5512_v36  ;;  %4840 = vmatmul.mubr.msk.f32.vlgmr.msra.gmra.mrb[0].mxu1 %vm677_vm3, %v665_v49  ;;  %v1252_v4 = vld [vmem:[%s7207_s23 + $0x28] sm:$0xff]  ;;  %v4876_v10 = vld [vmem:[%s7203_s24 + $0x110] sm:$0xff]  ;;  %v1254_v15 = vld [vmem:[%s7207_s23 + $0x38] sm:$0xff]  ;;  %v1225_v49 = vlaneseq }
  0x35   : > { %764 = vmatprep.mubr.f32.mxu1 %v5946_v7  ;;  %5534 = vmatpush1.bf16.msra.mxu1 %v5533_v58  ;;  %v4879_v11 = vld [vmem:[%s7203_s24 + $0x128] sm:$0xff]  ;;  %v5539_v12 = vpack.c.bf16 %v1252_v4, %v1251_v3  ;;  %v1253_v14 = vld [vmem:[%s7207_s23 + $0x30] sm:$0xff]  ;;  %v5524_v17 = vpack.c.bf16 %v4876_v10, %v4874_v8  ;;  %v1255_v22 = vld [vmem:[%s7207_s23 + $0x40] sm:$0xff] }
  0x36   : > { %4847 = vmatmul.mubr.msk.f32.gmra.mrb[4].mxu0 %vm677_vm3, %v656_v43  ;;  %5535 = vmatprep.subr.bf16.mxu1 %v5948_v53  ;;  %v991_v16 = vld [vmem:[%s6164_s4 + $0x3] sm:$0xff]  ;;  %v5526_v18 = vpack.c.bf16 %v4881_v13, %v4879_v11  ;;  %v4880_v20 = vld [vmem:[%s7203_s24 + $0x130] sm:$0xf]  ;;  %v5542_v21 = vpack.c.bf16 %v1254_v15, %v1253_v14  ;;  %v1258_v28 = vld [vmem:[%s7207_s23 + $0x58] sm:$0xff]  ;;  %v1226_v50 = vshrl.u32 %v1225_v49, 7 }
  0x37   : > { %966 = vmatprep.mubr.f32.mxu0 %v5946_v7  ;;  %v1256_v23 = vld [vmem:[%s7207_s23 + $0x48] sm:$0xff]  ;;  %v5529_v25 = vpack.c.bf16 %v4880_v20, %v4878_v19  ;;  %v1257_v27 = vld [vmem:[%s7207_s23 + $0x50] sm:$0xff]  ;;  %v1259_v31 = vld [vmem:[%s7207_s23 + $0x60] sm:$0xff] }
  0x38   : > { %4841 = vmatmul.mubr.msk.f32.gmra.mrb[2].mxu1 %vm677_vm3, %v666_v62  ;;  %v992_v24 = vld [vmem:[%s6164_s4 + $0xb] sm:$0xff]  ;;  %v5545_v26 = vpack.c.bf16 %v1256_v23, %v1255_v22  ;;  %v993_v29 = vld [vmem:[%s6164_s4 + $0x13] sm:$0xff]  ;;  %v5548_v30 = vpack.c.bf16 %v1258_v28, %v1257_v27  ;;  %v1263_v40 = vld [vmem:[%s7207_s23 + $0x80] sm:$0xff] }
  0x39   : > { %770 = vmatprep.mubr.f32.mxu1 %v5946_v7  ;;  %5537 = vmatpush1.bf16.msra.mxu1 %v5536_v2  ;;  %v1260_v32 = vld [vmem:[%s7207_s23 + $0x68] sm:$0xff]  ;;  %v1109_v36 = vld [vmem:[%s6164_s4 + $0x14] sm:$0xff]  ;;  %v1355_v62 = vld [vmem:[%s7209_s21] sm:$0xff] }
  0x3a   : > { %4858 = vmatmul.mubr.msk.f32.vlgmr.msra.gmra.mrb[0].mxu0 %vm677_vm3, %v875_v51  ;;  %5538 = vmatprep.subr.bf16.mxu1 %v5948_v53  ;;  %v1107_v33 = vld [vmem:[%s6164_s4 + $0x4] sm:$0xff]  ;;  %v5551_v34 = vpack.c.bf16 %v1260_v32, %v1259_v31  ;;  %v1108_v35 = vld [vmem:[%s6164_s4 + $0xc] sm:$0xff]  ;;  %v1262_v38 = vld [vmem:[%s7207_s23 + $0x78] sm:$0xff]  ;;  %v1227_v51 = vsub.s32 0, %v1226_v50 }
  0x3b   : > { %972 = vmatprep.mubr.f32.mxu0 %v5946_v7  ;;  %5515 = vmatpush1.bf16.msra.mxu0 %v5514_v52  ;;  %v1261_v37 = vld [vmem:[%s7207_s23 + $0x70] sm:$0xff]  ;;  %v1264_v41 = vld [vmem:[%s7207_s23 + $0x88] sm:$0xff]  ;;  %v1223_v52 = vld [vmem:[%s7208_s22] sm:$0x3]  ;;  %s5024_s22 = sshll.u32 %s6087_s3, 4  ;;  %s5955_s3 = smov [#allocation3]  }
  0x3c   : > { %5518 = vmatprep.subr.msk.bf16.mxu0 %vm6136_vm2, %v5516_v54  ;;  %4842 = vmatmul.mubr.msk.f32.gmra.mrb[4].mxu1 %vm677_vm3, %v667_v5  ;;  %v5554_v39 = vpack.c.bf16 %v1262_v38, %v1261_v37  ;;  %v5557_v42 = vpack.c.bf16 %v1264_v41, %v1263_v40  ;;  %v1231_v54 = vsub.s32 1, %v1226_v50  ;;  %v1228_v55 = vrot.slane %v1223_v52, %v1227_v51  ;;  %v1357_v11 = vld [vmem:[%s7209_s21 + $0x10] sm:$0xff]  ;;  %v1359_v22 = vld [vmem:[%s7209_s21 + $0x20] sm:$0xff]  ;;  %v1360_v23 = vld [vmem:[%s7209_s21 + $0x28] sm:$0xff] }
  0x3d   : > { %5540 = vmatpush1.bf16.msra.mxu1 %v5539_v12  ;;  %v1358_v12 = vld [vmem:[%s7209_s21 + $0x18] sm:$0xff]  ;;  %v1361_v28 = vld [vmem:[%s7209_s21 + $0x30] sm:$0xff]  ;;  %v1363_v31 = vld [vmem:[%s7209_s21 + $0x40] sm:$0xff] }
  0x3e   : > { %4859 = vmatmul.mubr.msk.f32.gmra.mrb[2].mxu0 %vm677_vm3, %v876_v63  ;;  %5541 = vmatprep.subr.bf16.mxu1 %v5948_v53  ;;  %v1232_v57 = vrot.slane %v1223_v52, %v1231_v54  ;;  %v1356_v63 = vld [vmem:[%s7209_s21 + $0x8] sm:$0xff]  ;;  %v5563_v19 = vpack.c.bf16 %v1358_v12, %v1357_v11  ;;  %v1367_v37 = vld [vmem:[%s7209_s21 + $0x60] sm:$0xff]  ;;  %v1369_v40 = vld [vmem:[%s7209_s21 + $0x70] sm:$0xff] }
  0x3f   : > { %978 = vmatprep.mubr.f32.mxu0 %v5946_v7  ;;  %5521 = vmatpush1.bf16.msk.msra.mxu0 %vm6136_vm2, %v5519_v0  ;;  %v1364_v32 = vld [vmem:[%s7209_s21 + $0x48] sm:$0xff]  ;;  %v1370_v41 = vld [vmem:[%s7209_s21 + $0x78] sm:$0xff] }
  0x40   : > { %5523 = vmatprep.subr.bf16.mxu0 %v5522_v1  ;;  %v1368_v38 = vld [vmem:[%s7209_s21 + $0x68] sm:$0xff] }
  0x41   : > { %5543 = vmatpush1.bf16.msra.mxu1 %v5542_v21 }
  0x42   : > { %4860 = vmatmul.mubr.msk.f32.gmra.mrb[4].mxu0 %vm677_vm3, %v877_v6  ;;  %5544 = vmatprep.subr.bf16.mxu1 %v5948_v53  ;;  %v5560_v6 = vpack.c.bf16 %v1356_v63, %v1355_v62 }
  0x43   : > { %1082 = vmatprep.mubr.f32.mxu0 %v5946_v7 }
  0x45   : > { %5546 = vmatpush1.bf16.msra.mxu1 %v5545_v26  ;;  %v5566_v26 = vpack.c.bf16 %v1360_v23, %v1359_v22 }
  0x46   : > { %4871 = vmatmul.mubr.msk.f32.vlgmr.msra.gmra.mrb[0].mxu0 %vm677_vm3, %v991_v16  ;;  %5547 = vmatprep.subr.bf16.mxu1 %v5948_v53 }
  0x47   : > { %1088 = vmatprep.mubr.f32.mxu0 %v5946_v7  ;;  %5525 = vmatpush1.bf16.msra.mxu0 %v5524_v17 }
  0x48   : > { %5528 = vmatprep.subr.msk.bf16.mxu0 %vm6136_vm2, %v5526_v18 }
  0x49   : > { %5549 = vmatpush1.bf16.msra.mxu1 %v5548_v30 }
  0x4a   : > { %4872 = vmatmul.mubr.msk.f32.gmra.mrb[2].mxu0 %vm677_vm3, %v992_v24  ;;  %5550 = vmatprep.subr.bf16.mxu1 %v5948_v53 }
  0x4b   : > { %1094 = vmatprep.mubr.f32.mxu0 %v5946_v7  ;;  %5531 = vmatpush1.bf16.msk.msra.mxu0 %vm6136_vm2, %v5529_v25 }
  0x4d   : > { %5552 = vmatpush1.bf16.msra.mxu1 %v5551_v34  ;;  %v1365_v34 = vld [vmem:[%s7209_s21 + $0x50] sm:$0xff] }
  0x4e   : > { %4873 = vmatmul.mubr.msk.f32.gmra.mrb[4].mxu0 %vm677_vm3, %v993_v29  ;;  %5553 = vmatprep.subr.bf16.mxu1 %v5948_v53  ;;  %v1362_v29 = vld [vmem:[%s7209_s21 + $0x38] sm:$0xff] }
  0x4f   : > { %1198 = vmatprep.mubr.f32.mxu0 %v5946_v7  ;;  %v5569_v30 = vpack.c.bf16 %v1362_v29, %v1361_v28  ;;  %v4919_v28 = vld [vmem:[%s7212_s7 + $0x60] sm:$0xff]  ;;  %v4920_v29 = vld [vmem:[%s7212_s7 + $0x68] sm:$0xf] }
  0x51   : > { %5555 = vmatpush1.bf16.msra.mxu1 %v5554_v39  ;;  %v5578_v39 = vpack.c.bf16 %v1368_v38, %v1367_v37  ;;  %v4923_v37 = vld [vmem:[%s7212_s7 + $0x70] sm:$0xff]  ;;  %v4924_v38 = vld [vmem:[%s7212_s7 + $0x78] sm:$0xf] }
  0x52   : > { %4884 = vmatmul.mubr.msk.f32.vlgmr.msra.gmra.mrb[0].mxu0 %vm677_vm3, %v1107_v33  ;;  %5556 = vmatprep.subr.bf16.mxu1 %v5948_v53  ;;  %v5572_v33 = vpack.c.bf16 %v1364_v32, %v1363_v31 }
  0x53   : > { %1204 = vmatprep.mubr.f32.mxu0 %v5946_v7 }
  0x55   : > { %5558 = vmatpush1.bf16.msra.mxu1 %v5557_v42  ;;  %v5581_v42 = vpack.c.bf16 %v1370_v41, %v1369_v40  ;;  %v4927_v40 = vld [vmem:[%s7212_s7 + $0x80] sm:$0xff] }
  0x56   : > { %4885 = vmatmul.mubr.msk.f32.gmra.mrb[2].mxu0 %vm677_vm3, %v1108_v35  ;;  %5559 = vmatprep.subr.bf16.mxu1 %v5948_v53  ;;  %v1366_v35 = vld [vmem:[%s7209_s21 + $0x58] sm:$0xff] }
  0x57   : > { %1210 = vmatprep.mubr.f32.mxu0 %v5946_v7 }
  0x5a   : > { %4886 = vmatmul.mubr.msk.f32.gmra.mrb[4].mxu0 %vm677_vm3, %v1109_v36  ;;  %v5575_v36 = vpack.c.bf16 %v1366_v35, %v1365_v34  ;;  %v4916_v34 = vld [vmem:[%s7212_s7 + $0x58] sm:$0xf]  ;;  %v5619_v35 = vpack.c.bf16 %v4920_v29, %v4919_v28  ;;  %v4976_v29 = vld [vmem:[%s7212_s7 + $0x148] sm:$0xf] }
 0x107   : > { %v760_v43 = vpop.f32.mrb[0].mxu1 }
 0x108   : > { %v762_v44 = vpop.f32.mrb[1].mxu1 }
 0x10b   : > { %v766_v45 = vpop.f32.mrb[2].mxu1 }
 0x10c   : > { %v768_v46 = vpop.f32.mrb[3].mxu1 }
 0x10f   : > { %v772_v47 = vpop.f32.mrb[4].mxu1 }
 0x110   : > { %v774_v48 = vpop.f32.mrb[5].mxu1 }
 0x125   : > { %v1200_v56 = vpop.f32.mrb[0].mxu0 }
 0x126   : > { %v5810_v58 = vadd.f32 %v1200_v56, %v760_v43  ;;  %v1202_v59 = vpop.f32.mrb[1].mxu0  ;;  %v1371_v43 = vld [vmem:[%s7209_s21 + $0x80] sm:$0xff] }
 0x127   : > { %v5811_v60 = vadd.f32 %v1202_v59, %v762_v44  ;;  %v1372_v44 = vld [vmem:[%s7209_s21 + $0x88] sm:$0xff] }
 0x128   : > { %v6378_v61 = vadd.f32 %v5810_v58, %v1228_v55 }
 0x129   : > { %v1236_v0 = vadd.f32 %v5811_v60, %v1232_v57  ;;  %v1206_v1 = vpop.f32.mrb[2].mxu0 }
 0x12a   : > { %v5812_v2 = vadd.f32 %v1206_v1, %v766_v45  ;;  %v1208_v3 = vpop.f32.mrb[3].mxu0  ;;  %v1241_v8 = vmax.f32 %v6378_v61, 0.0  ;;  %v5584_v45 = vpack.c.bf16 %v1372_v44, %v1371_v43  ;;  %v1540_v1 = vld [vmem:[%s7211_s6] sm:$0xff]  ;;  %v4931_v43 = vld [vmem:[%s7212_s7 + $0x90] sm:$0xff]  ;;  %v4932_v44 = vld [vmem:[%s7212_s7 + $0x98] sm:$0xf] }
 0x12b   : > { %v1242_v4 = vmax.f32 %v1236_v0, 0.0  ;;  %v5813_v5 = vadd.f32 %v1208_v3, %v768_v46  ;;  %v1456_v46 = vld [vmem:[%s7210_s29] sm:$0xff]  ;;  %v1457_v0 = vld [vmem:[%s7210_s29 + $0x8] sm:$0xf]  ;;  %v4897_v3 = vld [vmem:[%s7212_s7 + $0x10] sm:$0xff] }
 0x12c   : > { %v6387_v10 = vadd.f32 %v5812_v2, %v1228_v55  ;;  %5174 = vmatprep.mubr.msk.f32.mxu0 %vm1458_vm5, %v1456_v46  ;;  %v1541_v2 = vld [vmem:[%s7211_s6 + $0x8] sm:$0xf] }
 0x12d   : > { %v1238_v13 = vadd.f32 %v5813_v5, %v1232_v57  ;;  %v1212_v14 = vpop.f32.mrb[4].mxu0  ;;  %4887 = vmatprep.mubr.msk.f32.mxu1 %vm1265_vm4, %v1242_v4  ;;  %v4903_v5 = vld [vmem:[%s7212_s7 + $0x20] sm:$0xff] }
 0x12e   : > { %v5814_v15 = vadd.f32 %v1212_v14, %v772_v47  ;;  %v1214_v16 = vpop.f32.mrb[5].mxu0  ;;  %1340 = vmatmul.mubr.f32.vlgmr.msra.gmra.mrb[6].mxu1 %v1241_v8  ;;  %v1243_v20 = vmax.f32 %v6387_v10, 0.0 }
 0x12f   : > { %v1244_v17 = vmax.f32 %v1238_v13, 0.0  ;;  %v5815_v18 = vadd.f32 %v1214_v16, %v774_v48  ;;  %5561 = vmatpush1.bf16.msra.mxu1 %v5560_v6 }
 0x130   : > { %v1239_v21 = vadd.f32 %v5814_v15, %v1228_v55  ;;  %5562 = vmatprep.subr.bf16.mxu1 %v5948_v53 }
 0x131   : > { %v1240_v24 = vadd.f32 %v5815_v18, %v1232_v57  ;;  %4888 = vmatprep.mubr.msk.f32.mxu1 %vm1265_vm4, %v1244_v17  ;;  %v1631_v18 = vld [vmem:[%s7212_s7 + $0x8] sm:$0xf] }
 0x132   : > { %1345 = vmatmul.mubr.f32.gmra.mrb[8].mxu1 %v1243_v20  ;;  %v1245_v27 = vmax.f32 %v1239_v21, 0.0 }
 0x133   : > { %v1246_v25 = vmax.f32 %v1240_v24, 0.0  ;;  %5564 = vmatpush1.bf16.msra.mxu1 %v5563_v19  ;;  %v4911_v19 = vld [vmem:[%s7212_s7 + $0x40] sm:$0xff] }
 0x134   : > { %5565 = vmatprep.subr.bf16.mxu1 %v5948_v53 }
 0x135   : > { %4889 = vmatprep.mubr.msk.f32.mxu1 %vm1265_vm4, %v1246_v25 }
 0x136   : > { %1350 = vmatmul.mubr.f32.gmra.mrb[10].mxu1 %v1245_v27 }
 0x137   : > { %5567 = vmatpush1.bf16.msra.mxu1 %v5566_v26  ;;  %4890 = vmatprep.mubr.msk.f32.mxu1 %vm1265_vm4, %v1242_v4  ;;  %v4898_v4 = vld [vmem:[%s7212_s7 + $0x18] sm:$0xf]  ;;  %v4907_v26 = vld [vmem:[%s7212_s7 + $0x30] sm:$0xff] }
 0x138   : > { %5568 = vmatprep.subr.bf16.mxu1 %v5948_v53  ;;  %v5595_v6 = vpack.c.bf16 %v4898_v4, %v4897_v3  ;;  %v4952_v3 = vld [vmem:[%s7212_s7 + $0xe8] sm:$0xf]  ;;  %v4955_v4 = vld [vmem:[%s7212_s7 + $0xf0] sm:$0xff] }
 0x13b   : > { %5570 = vmatpush1.bf16.msra.mxu1 %v5569_v30 }
 0x13c   : > { %5571 = vmatprep.subr.bf16.mxu1 %v5948_v53 }
 0x13f   : > { %5573 = vmatpush1.bf16.msra.mxu1 %v5572_v33  ;;  %v4915_v33 = vld [vmem:[%s7212_s7 + $0x50] sm:$0xff] }
 0x140   : > { %5574 = vmatprep.subr.bf16.mxu1 %v5948_v53 }
 0x143   : > { %5576 = vmatpush1.bf16.msra.mxu1 %v5575_v36  ;;  %v5615_v36 = vpack.c.bf16 %v4916_v34, %v4915_v33 }
 0x144   : > { %5577 = vmatprep.subr.bf16.mxu1 %v5948_v53 }
 0x147   : > { %5579 = vmatpush1.bf16.msra.mxu1 %v5578_v39  ;;  %v5623_v39 = vpack.c.bf16 %v4924_v38, %v4923_v37  ;;  %v4984_v37 = vld [vmem:[%s7212_s7 + $0x168] sm:$0xf]  ;;  %v4987_v38 = vld [vmem:[%s7212_s7 + $0x170] sm:$0xff] }
 0x148   : > { %5580 = vmatprep.subr.bf16.mxu1 %v5948_v53 }
 0x14b   : > { %5582 = vmatpush1.bf16.msra.mxu1 %v5581_v42  ;;  %v4928_v42 = vld [vmem:[%s7212_s7 + $0x88] sm:$0xf] }
 0x14c   : > { %5583 = vmatprep.subr.bf16.mxu1 %v5948_v53  ;;  %v5627_v46 = vpack.c.bf16 %v4928_v42, %v4927_v40 }
 0x14f   : > { %5585 = vmatpush1.bf16.msra.mxu1 %v5584_v45 }
 0x150   : > { %5602 = vmatprep.subr.bf16.mxu1 %v5948_v53 }
 0x152   : > { %1438 = vmatmul.mubr.f32.vlgmr.msra.gmra.mrb[12].mxu1 %v1241_v8  ;;  %v4904_v8 = vld [vmem:[%s7212_s7 + $0x28] sm:$0xf] }
 0x153   : > { %4891 = vmatprep.mubr.msk.f32.mxu1 %vm1265_vm4, %v1244_v17  ;;  %v5603_v10 = vpack.c.bf16 %v4904_v8, %v4903_v5  ;;  %v1630_v17 = vld [vmem:[%s7212_s7] sm:$0xff]  ;;  %v4956_v5 = vld [vmem:[%s7212_s7 + $0xf8] sm:$0xf] }
 0x154   : > { %v5599_v21 = vpack.c.bf16 %v1631_v18, %v1630_v17 }
 0x155   : > { %5605 = vmatpush3.bf16.msk.msra.mxu1 %vm6136_vm2, %v5603_v10  ;;  %v5655_v10 = vpack.c.bf16 %v4956_v5, %v4955_v4 }
 0x156   : > { %1443 = vmatmul.mubr.f32.gmra.mrb[14].mxu1 %v1243_v20  ;;  %5610 = vmatprep.subr.bf16.mxu1 %v5948_v53  ;;  %v4912_v20 = vld [vmem:[%s7212_s7 + $0x48] sm:$0xf] }
 0x157   : > { %4892 = vmatprep.mubr.msk.f32.mxu1 %vm1265_vm4, %v1246_v25  ;;  %v5611_v22 = vpack.c.bf16 %v4912_v20, %v4911_v19  ;;  %v4967_v19 = vld [vmem:[%s7212_s7 + $0x120] sm:$0xff] }
 0x15a   : > { %1448 = vmatmul.mubr.f32.gmra.mrb[16].mxu1 %v1245_v27  ;;  %v4908_v27 = vld [vmem:[%s7212_s7 + $0x38] sm:$0xf] }
 0x15b   : > { %5204 = vmatprep.mubr.msk.f32.mxu1 %vm5949_vm6, %v5946_v7  ;;  %v5607_v31 = vpack.c.bf16 %v4908_v27, %v4907_v26  ;;  %v4975_v27 = vld [vmem:[%s7212_s7 + $0x140] sm:$0xff] }
 0x15c   : > { %v5675_v33 = vpack.c.bf16 %v4976_v29, %v4975_v27  ;;  %v4069_v29 = vld [vmem:[%s7160_s9 + $0x18] sm:$0xff] }
 0x201   : > { %v1341_v47 = vpop.f32.mrb[6].mxu1 }
 0x202   : > { %v1343_v48 = vpop.f32.mrb[7].mxu1 }
 0x203   : > { %v4935_v48 = vld [vmem:[%s7212_s7 + $0xa0] sm:$0xff] }
 0x205   : > { %v1346_v49 = vpop.f32.mrb[8].mxu1 }
 0x206   : > { %v1348_v50 = vpop.f32.mrb[9].mxu1 }
 0x207   : > { %v4936_v50 = vld [vmem:[%s7212_s7 + $0xa8] sm:$0xf] }
 0x209   : > { %v1351_v51 = vpop.f32.mrb[10].mxu1 }
 0x20a   : > { %v1353_v52 = vpop.f32.mrb[11].mxu1 }
 0x20b   : > { %v4940_v52 = vld [vmem:[%s7212_s7 + $0xb8] sm:$0xf] }
 0x225   : > { %v1439_v54 = vpop.f32.mrb[12].mxu1 }
 0x226   : > { %v1453_v55 = vmax.f32 %v1341_v47, %v1439_v54  ;;  %v1441_v56 = vpop.f32.mrb[13].mxu1  ;;  %v5631_v47 = vpack.c.bf16 %v4932_v44, %v4931_v43  ;;  %v4991_v43 = vld [vmem:[%s7212_s7 + $0x180] sm:$0xff] }
 0x229   : > { %v1444_v57 = vpop.f32.mrb[14].mxu1 }
 0x22a   : > { %v1454_v58 = vmax.f32 %v1346_v49, %v1444_v57  ;;  %v1446_v59 = vpop.f32.mrb[15].mxu1  ;;  %v4943_v57 = vld [vmem:[%s7212_s7 + $0xc0] sm:$0xff] }
 0x22b   : > { %v4944_v59 = vld [vmem:[%s7212_s7 + $0xc8] sm:$0xf] }
 0x22c   : > { %v5586_v60 = vpack.c.bf16 %v1454_v58, %v1453_v55  ;;  %v5635_v55 = vpack.c.bf16 %v4936_v50, %v4935_v48 }
 0x22d   : > { %v1449_v61 = vpop.f32.mrb[16].mxu1 }
 0x22e   : > { %v1455_v62 = vmax.f32 %v1351_v51, %v1449_v61  ;;  %v1451_v63 = vpop.f32.mrb[17].mxu1  ;;  %5587 = vmatprep.subr.bf16.mxu0 %v5586_v60  ;;  %v4939_v51 = vld [vmem:[%s7212_s7 + $0xb0] sm:$0xff]  ;;  %v4948_v61 = vld [vmem:[%s7212_s7 + $0xd8] sm:$0xf] }
 0x22f   : > { %5589 = vmatpush3.bf16.msra.mxu0 %v5586_v60  ;;  %v5639_v56 = vpack.c.bf16 %v4940_v52, %v4939_v51  ;;  %v5643_v63 = vpack.c.bf16 %v4944_v59, %v4943_v57  ;;  %v4999_v51 = vld [vmem:[%s7212_s7 + $0x1a0] sm:$0xff]  ;;  %v5000_v52 = vld [vmem:[%s7212_s7 + $0x1a8] sm:$0xf] }
 0x230   : > { %5172 = vmatprep.subr.mxu0 %v1455_v62 }
 0x233   : > { %5173 = vmatpush3.msra.mxu0 %v1455_v62 }
 0x234   : > { %5591 = vmatprep.subr.bf16.mxu0 %v5586_v60  ;;  %5175 = vmatmul.mubr.msk.f32.vlgmr.msra.gmra.mrb[6].mxu0 %vm1458_vm5, %v1457_v0 }
 0x235   : > { %5593 = vmatpush3.bf16.msra.mxu0 %v5586_v60  ;;  %5183 = vmatprep.mubr.msk.f32.mxu0 %vm1458_vm5, %v1540_v1  ;;  %v4947_v60 = vld [vmem:[%s7212_s7 + $0xd0] sm:$0xff]  ;;  %v4951_v1 = vld [vmem:[%s7212_s7 + $0xe0] sm:$0xff] }
 0x236   : > { %5181 = vmatprep.subr.mxu0 %v1455_v62  ;;  %v5647_v0 = vpack.c.bf16 %v4948_v61, %v4947_v60  ;;  %v5651_v8 = vpack.c.bf16 %v4952_v3, %v4951_v1  ;;  %v5007_v60 = vld [vmem:[%s7212_s7 + $0x1c0] sm:$0xff]  ;;  %v5008_v61 = vld [vmem:[%s7212_s7 + $0x1c8] sm:$0xf] }
 0x239   : > { %5182 = vmatpush3.msra.mxu0 %v1455_v62 }
 0x23a   : > { %5184 = vmatmul.mubr.msk.f32.vlgmr.msra.gmra.mrb[8].mxu0 %vm1458_vm5, %v1541_v2  ;;  %5594 = vmatprep.subr.bf16.mxu0 %v5948_v53 }
 0x23b   : > { %5190 = vmatprep.mubr.msk.f32.mxu0 %vm5949_vm6, %v5946_v7  ;;  %5597 = vmatpush3.bf16.msk.msra.mxu0 %vm6136_vm2, %v5595_v6 }
 0x23c   : > { %5598 = vmatprep.subr.bf16.mxu0 %v5948_v53 }
 0x307   : > { %v5176_v11 = vpop.f32.mrb[6].mxu0 }
 0x308   : > { %v1531_v12 = vpop.f32.mrb[7].mxu0 }
 0x30d   : > { %v5185_v13 = vpop.f32.mrb[8].mxu0 }
 0x30e   : > { %v1624_v14 = vmax.f32 %v5176_v11, %v5185_v13  ;;  %v1614_v15 = vpop.f32.mrb[9].mxu0  ;;  %v4959_v11 = vld [vmem:[%s7212_s7 + $0x100] sm:$0xff]  ;;  %v4960_v13 = vld [vmem:[%s7212_s7 + $0x108] sm:$0xf] }
 0x30f   : > { %v1623_v16 = vmax.f32 %v1531_v12, %v1614_v15  ;;  %v4964_v15 = vld [vmem:[%s7212_s7 + $0x118] sm:$0xf]  ;;  %v5659_v17 = vpack.c.bf16 %v4960_v13, %v4959_v11 }
 0x310   : > { %1628 = vst.msk [vmem:[#allocation2 + $0x8] sm:$0xf] %vm1627_vm7, %v1624_v14  ;;  %v4963_v14 = vld [vmem:[%s7212_s7 + $0x110] sm:$0xff] }
 0x311   : > { %1626 = vst.msk [vmem:[#allocation2] sm:$0xff] %vm1625_vm8, %v1623_v16  ;;  %v5663_v18 = vpack.c.bf16 %v4964_v15, %v4963_v14 }
 0x318   : > { %v1789_v23 = vld [vmem:[#allocation2 + $0x2] sm:$0xff] }
 0x319   : > { %v1632_v24 = vld [vmem:[#allocation2 + $0x1] sm:$0xff]  ;;  %2197 = vrot.lane.b32.xlu1 %v1789_v23, %s5950_s28  ;;  %5205 = vmatmul.mubr.msk.f32.vlgmr.msra.gmra.mrb[18].mxu1 %vm1636_vm9, %v1789_v23 }
 0x31a   : > { %v1629_v25 = vld [vmem:[#allocation2] sm:$0xff]  ;;  %5191 = vmatmul.mubr.msk.f32.vlgmr.msra.gmra.mrb[10].mxu0 %vm1636_vm9, %v1632_v24  ;;  %5613 = vmatpush3.bf16.msk.msra.mxu1 %vm6136_vm2, %v5611_v22  ;;  %v4971_v22 = vld [vmem:[%s7212_s7 + $0x130] sm:$0xff] }
 0x31b   : > { %2035 = vrot.lane.b32.xlu0 %v1629_v25, %s5950_s28  ;;  %5601 = vmatpush3.bf16.msk.msra.mxu0 %vm6136_vm2, %v5599_v21  ;;  %v1870_v30 = vld [vmem:[#allocation2 + $0x3] sm:$0xff] }
 0x31c   : > { %5197 = vmatprep.mubr.msk.f32.mxu0 %vm5949_vm6, %v5946_v7  ;;  %5218 = vmatprep.mubr.msk.f32.mxu1 %vm5949_vm6, %v5946_v7  ;;  %v1951_v32 = vld [vmem:[#allocation2 + $0x4] sm:$0xff] }
 0x31d   : > { %2278 = vrot.lane.b32.xlu1 %v1870_v30, %s5950_s28  ;;  %5606 = vmatprep.subr.bf16.mxu0 %v5948_v53  ;;  %v4968_v21 = vld [vmem:[%s7212_s7 + $0x128] sm:$0xf] }
 0x31e   : > { %5219 = vmatmul.mubr.msk.f32.vlgmr.msra.gmra.mrb[20].mxu1 %vm1636_vm9, %v1951_v32  ;;  %5198 = vmatmul.mubr.msk.f32.vlgmr.msra.gmra.mrb[12].mxu0 %vm1636_vm9, %v1629_v25 }
 0x31f   : > { %2116 = vrot.lane.b32.xlu0 %v1632_v24, %s5950_s28  ;;  %5618 = vmatprep.subr.bf16.mxu1 %v5948_v53 }
 0x320   : > { %5609 = vmatpush3.bf16.msk.msra.mxu0 %vm6136_vm2, %v5607_v31  ;;  %5211 = vmatprep.mubr.msk.f32.mxu0 %vm5949_vm6, %v5946_v7  ;;  %v4980_v31 = vld [vmem:[%s7212_s7 + $0x158] sm:$0xf] }
 0x321   : > { %2440 = vrot.lane.b32.xlu1 %v1629_v25, %s5951_s1  ;;  %5614 = vmatprep.subr.bf16.mxu0 %v5948_v53 }
 0x322   : > { %5621 = vmatpush3.bf16.msk.msra.mxu1 %vm6136_vm2, %v5619_v35  ;;  %5232 = vmatprep.mubr.msk.f32.mxu1 %vm5949_vm6, %v5946_v7  ;;  %v4983_v35 = vld [vmem:[%s7212_s7 + $0x160] sm:$0xff] }
 0x323   : > { %2359 = vrot.lane.b32.xlu0 %v1951_v32, %s5950_s28  ;;  %5212 = vmatmul.mubr.msk.f32.vlgmr.msra.gmra.mrb[14].mxu0 %vm1636_vm9, %v1870_v30  ;;  %s5952_s28 = smov 92  }
 0x324   : > { %5617 = vmatpush3.bf16.msk.msra.mxu0 %vm6136_vm2, %v5615_v36  ;;  %5225 = vmatprep.mubr.msk.f32.mxu0 %vm5949_vm6, %v5946_v7 }
 0x325   : > { %2602 = vrot.lane.b32.xlu1 %v1789_v23, %s5951_s1  ;;  %5622 = vmatprep.subr.bf16.mxu0 %v5948_v53 }
 0x326   : > { %5626 = vmatprep.subr.bf16.mxu1 %v5948_v53 }
 0x327   : > { %2521 = vrot.lane.b32.xlu0 %v1632_v24, %s5951_s1 }
 0x329   : > { %2764 = vrot.lane.b32.xlu1 %v1951_v32, %s5951_s1 }
 0x32b   : > { %2683 = vrot.lane.b32.xlu0 %v1870_v30, %s5951_s1  ;;  %s4769_s1 = sshll.u32 %s648_s27, 4  ;;  %s7111_s1 = int_to_ptr.vmem [resolvable:$true] %s4769_s1 }
 0x32c   : > { %s5882_s4 = scalar_lea.vmem %s7111_s1, 16 }
 0x32d   : > { %2926 = vrot.lane.b32.xlu1 %v1632_v24, %s5952_s28  ;;  %p5883_p11 = scmp.ne.s32.totalorder %s7111_s1, %s5882_s4 }
 0x32f   : > { %2845 = vrot.lane.b32.xlu0 %v1629_v25, %s5952_s28  ;;  %p5884_p12 = pnand %p5883_p11, %p6104_p5 }
 0x331   : > { %3088 = vrot.lane.b32.xlu1 %v1870_v30, %s5952_s28  ;;  %p5885_p13 = pneg %p5884_p12 }
 0x333   : > { %3007 = vrot.lane.b32.xlu0 %v1789_v23, %s5952_s28 }
 0x335   : > { %3250 = vrot.lane.b32.xlu1 %v1629_v25, %s5953_s2 }
 0x337   : > { %3169 = vrot.lane.b32.xlu0 %v1951_v32, %s5952_s28 }
 0x339   : > { %3412 = vrot.lane.b32.xlu1 %v1789_v23, %s5953_s2 }
 0x33b   : > { %3331 = vrot.lane.b32.xlu0 %v1632_v24, %s5953_s2 }
 0x33d   : > { %3574 = vrot.lane.b32.xlu1 %v1951_v32, %s5953_s2 }
 0x33f   : > { %3493 = vrot.lane.b32.xlu0 %v1870_v30, %s5953_s2 }
 0x341   : > { %3736 = vrot.lane.b32.xlu1 %v1632_v24, %s5954_s26 }
 0x343   : > { %3655 = vrot.lane.b32.xlu0 %v1629_v25, %s5954_s26  ;;  %v5667_v25 = vpack.c.bf16 %v4968_v21, %v4967_v19 }
 0x345   : > { %3898 = vrot.lane.b32.xlu1 %v1870_v30, %s5954_s26  ;;  %v4979_v30 = vld [vmem:[%s7212_s7 + $0x150] sm:$0xff] }
 0x346   : > { %v5679_v34 = vpack.c.bf16 %v4980_v31, %v4979_v30  ;;  %v4154_v30 = vld [vmem:[%s7161_s10 + $0x10] sm:$0xff] }
 0x347   : > { %3817 = vrot.lane.b32.xlu0 %v1789_v23, %s5954_s26  ;;  %v4972_v23 = vld [vmem:[%s7212_s7 + $0x138] sm:$0xf] }
 0x348   : > { %v5671_v26 = vpack.c.bf16 %v4972_v23, %v4971_v22  ;;  %v4066_v22 = vld [vmem:[%s7160_s9] sm:$0xff]  ;;  %v4067_v23 = vld [vmem:[%s7160_s9 + $0x8] sm:$0xff] }
 0x34b   : > { %3979 = vrot.lane.b32.xlu0 %v1951_v32, %s5954_s26  ;;  %s7215_s26 = sld [smem:[#allocation22_spill]] }
 0x351   : > { %s7216_s6 = smov %s7215_s26 }
 0x38b   : > { %v2198_v41 = vpop.permute.xlu1 %2197 }
 0x38d   : > { %v2036_v45 = vpop.permute.xlu0 %2035 }
 0x38e   : > { %5226 = vmatmul.mubr.msk.f32.vlgmr.msra.gmra.mrb[16].mxu0 %vm1636_vm9, %v2036_v45  ;;  %v4992_v45 = vld [vmem:[%s7212_s7 + $0x188] sm:$0xf] }
 0x38f   : > { %5625 = vmatpush3.bf16.msk.msra.mxu0 %vm6136_vm2, %v5623_v39  ;;  %5239 = vmatprep.mubr.msk.f32.mxu0 %vm5949_vm6, %v5946_v7  ;;  %v2279_v49 = vpop.permute.xlu1 %2278  ;;  %v4988_v39 = vld [vmem:[%s7212_s7 + $0x178] sm:$0xf] }
 0x390   : > { %5630 = vmatprep.subr.bf16.mxu0 %v5948_v53  ;;  %v5687_v42 = vpack.c.bf16 %v4988_v39, %v4987_v38  ;;  %v4157_v38 = vld [vmem:[%s7161_s10 + $0x28] sm:$0xff] }
 0x391   : > { %v2117_v54 = vpop.permute.xlu0 %2116 }
 0x392   : > { %5233 = vmatmul.mubr.msk.f32.vlgmr.msra.gmra.mrb[22].mxu1 %vm1636_vm9, %v2117_v54  ;;  %5240 = vmatmul.mubr.msk.f32.vlgmr.msra.gmra.mrb[18].mxu0 %vm1636_vm9, %v2198_v41  ;;  %v5683_v41 = vpack.c.bf16 %v4984_v37, %v4983_v35  ;;  %v5003_v54 = vld [vmem:[%s7212_s7 + $0x1b0] sm:$0xff]  ;;  %v4071_v35 = vld [vmem:[%s7160_s9 + $0x28] sm:$0xff] }
 0x393   : > { %5629 = vmatpush3.bf16.msk.msra.mxu1 %vm6136_vm2, %v5627_v46  ;;  %5633 = vmatpush3.bf16.msk.msra.mxu0 %vm6136_vm2, %v5631_v47  ;;  %v2441_v58 = vpop.permute.xlu1 %2440  ;;  %v4995_v46 = vld [vmem:[%s7212_s7 + $0x190] sm:$0xff]  ;;  %v4996_v47 = vld [vmem:[%s7212_s7 + $0x198] sm:$0xf] }
 0x394   : > { %5246 = vmatprep.mubr.msk.f32.mxu1 %vm5949_vm6, %v5946_v7  ;;  %5253 = vmatprep.mubr.msk.f32.mxu0 %vm5949_vm6, %v5946_v7  ;;  %v5695_v50 = vpack.c.bf16 %v4996_v47, %v4995_v46  ;;  %v4074_v46 = vld [vmem:[%s7160_s9 + $0x40] sm:$0xff]  ;;  %v4075_v47 = vld [vmem:[%s7160_s9 + $0x48] sm:$0xff] }
 0x395   : > { %v2360_v62 = vpop.permute.xlu0 %2359  ;;  %5634 = vmatprep.subr.bf16.mxu1 %v5948_v53  ;;  %5638 = vmatprep.subr.bf16.mxu0 %v5948_v53 }
 0x396   : > { %5247 = vmatmul.mubr.msk.f32.vlgmr.msra.gmra.mrb[24].mxu1 %vm1636_vm9, %v2279_v49  ;;  %5254 = vmatmul.mubr.msk.f32.vlgmr.msra.gmra.mrb[20].mxu0 %vm1636_vm9, %v2360_v62  ;;  %v5691_v49 = vpack.c.bf16 %v4992_v45, %v4991_v43  ;;  %v5011_v62 = vld [vmem:[%s7212_s7 + $0x1d0] sm:$0xff] }
 0x397   : > { %5637 = vmatpush3.bf16.msk.msra.mxu1 %vm6136_vm2, %v5635_v55  ;;  %5641 = vmatpush3.bf16.msk.msra.mxu0 %vm6136_vm2, %v5639_v56  ;;  %v2603_v2 = vpop.permute.xlu1 %2602  ;;  %v5004_v55 = vld [vmem:[%s7212_s7 + $0x1b8] sm:$0xf] }
 0x398   : > { %5260 = vmatprep.mubr.msk.f32.mxu1 %vm5949_vm6, %v5946_v7  ;;  %5267 = vmatprep.mubr.msk.f32.mxu0 %vm5949_vm6, %v5946_v7  ;;  %v5703_v59 = vpack.c.bf16 %v5004_v55, %v5003_v54  ;;  %v4077_v54 = vld [vmem:[%s7160_s9 + $0x58] sm:$0xff]  ;;  %v4162_v55 = vld [vmem:[%s7161_s10 + $0x50] sm:$0xff] }
 0x399   : > { %v2522_v6 = vpop.permute.xlu0 %2521  ;;  %5642 = vmatprep.subr.bf16.mxu1 %v5948_v53  ;;  %5646 = vmatprep.subr.bf16.mxu0 %v5948_v53 }
 0x39a   : > { %5261 = vmatmul.mubr.msk.f32.vlgmr.msra.gmra.mrb[26].mxu1 %vm1636_vm9, %v2441_v58  ;;  %5268 = vmatmul.mubr.msk.f32.vlgmr.msra.gmra.mrb[22].mxu0 %vm1636_vm9, %v2522_v6  ;;  %v5699_v58 = vpack.c.bf16 %v5000_v52, %v4999_v51  ;;  %v4076_v52 = vld [vmem:[%s7160_s9 + $0x50] sm:$0xff] }
 0x39b   : > { %5645 = vmatpush3.bf16.msk.msra.mxu1 %vm6136_vm2, %v5643_v63  ;;  %5649 = vmatpush3.bf16.msk.msra.mxu0 %vm6136_vm2, %v5647_v0  ;;  %v2765_v12 = vpop.permute.xlu1 %2764  ;;  %v5012_v63 = vld [vmem:[%s7212_s7 + $0x1d8] sm:$0xf]  ;;  %s7109_s7 = scalar_lea.hbm %s7215_s26, %s5024_s22 }
 0x39c   : > { %5274 = vmatprep.mubr.msk.f32.mxu1 %vm5949_vm6, %v5946_v7  ;;  %5281 = vmatprep.mubr.msk.f32.mxu0 %vm5949_vm6, %v5946_v7  ;;  %v5711_v3 = vpack.c.bf16 %v5012_v63, %v5011_v62 }
 0x39d   : > { %v2684_v16 = vpop.permute.xlu0 %2683  ;;  %5650 = vmatprep.subr.bf16.mxu1 %v5948_v53  ;;  %5654 = vmatprep.subr.bf16.mxu0 %v5948_v53 }
 0x39e   : > { %5275 = vmatmul.mubr.msk.f32.vlgmr.msra.gmra.mrb[28].mxu1 %vm1636_vm9, %v2603_v2  ;;  %5282 = vmatmul.mubr.msk.f32.vlgmr.msra.gmra.mrb[24].mxu0 %vm1636_vm9, %v2684_v16  ;;  %v5707_v2 = vpack.c.bf16 %v5008_v61, %v5007_v60 }
 0x39f   : > { %5653 = vmatpush3.bf16.msk.msra.mxu1 %vm6136_vm2, %v5651_v8  ;;  %5657 = vmatpush3.bf16.msk.msra.mxu0 %vm6136_vm2, %v5655_v10  ;;  %v2927_v20 = vpop.permute.xlu1 %2926 }
 0x3a0   : > { %5288 = vmatprep.mubr.msk.f32.mxu1 %vm5949_vm6, %v5946_v7  ;;  %5295 = vmatprep.mubr.msk.f32.mxu0 %vm5949_vm6, %v5946_v7 }
 0x3a1   : > { %v2846_v24 = vpop.permute.xlu0 %2845  ;;  %5658 = vmatprep.subr.bf16.mxu1 %v5948_v53  ;;  %5662 = vmatprep.subr.bf16.mxu0 %v5948_v53 }
 0x3a2   : > { %5289 = vmatmul.mubr.msk.f32.vlgmr.msra.gmra.mrb[30].mxu1 %vm1636_vm9, %v2765_v12  ;;  %5296 = vmatmul.mubr.msk.f32.vlgmr.msra.gmra.mrb[26].mxu0 %vm1636_vm9, %v2846_v24  ;;  %v4152_v24 = vld [vmem:[%s7161_s10] sm:$0xff] }
 0x3a3   : > { %5661 = vmatpush3.bf16.msk.msra.mxu1 %vm6136_vm2, %v5659_v17  ;;  %5665 = vmatpush3.bf16.msk.msra.mxu0 %vm6136_vm2, %v5663_v18  ;;  %v3089_v28 = vpop.permute.xlu1 %3088 }
 0x3a4   : > { %5302 = vmatprep.mubr.msk.f32.mxu1 %vm5949_vm6, %v5946_v7  ;;  %5309 = vmatprep.mubr.msk.f32.mxu0 %vm5949_vm6, %v5946_v7 }
 0x3a5   : > { %v3008_v32 = vpop.permute.xlu0 %3007  ;;  %5666 = vmatprep.subr.bf16.mxu1 %v5948_v53  ;;  %5670 = vmatprep.subr.bf16.mxu0 %v5948_v53 }
 0x3a6   : > { %5303 = vmatmul.mubr.msk.f32.vlgmr.msra.gmra.mrb[32].mxu1 %vm1636_vm9, %v2927_v20  ;;  %5310 = vmatmul.mubr.msk.f32.vlgmr.msra.gmra.mrb[28].mxu0 %vm1636_vm9, %v3008_v32  ;;  %v4155_v32 = vld [vmem:[%s7161_s10 + $0x18] sm:$0xff] }
 0x3a7   : > { %5669 = vmatpush3.bf16.msk.msra.mxu1 %vm6136_vm2, %v5667_v25  ;;  %5673 = vmatpush3.bf16.msk.msra.mxu0 %vm6136_vm2, %v5671_v26  ;;  %v3251_v36 = vpop.permute.xlu1 %3250  ;;  %v5715_v25 = vpack.c.bf16 %v4067_v23, %v4066_v22  ;;  %v4153_v26 = vld [vmem:[%s7161_s10 + $0x8] sm:$0xff] }
 0x3a8   : > { %5316 = vmatprep.mubr.msk.f32.mxu1 %vm5949_vm6, %v5946_v7  ;;  %5323 = vmatprep.mubr.msk.f32.mxu0 %vm5949_vm6, %v5946_v7  ;;  %v5733_v27 = vpack.c.bf16 %v4153_v26, %v4152_v24 }
 0x3a9   : > { %v3170_v40 = vpop.permute.xlu0 %3169  ;;  %5674 = vmatprep.subr.bf16.mxu1 %v5948_v53  ;;  %5678 = vmatprep.subr.bf16.mxu0 %v5948_v53 }
 0x3aa   : > { %5317 = vmatmul.mubr.msk.f32.vlgmr.msra.gmra.mrb[34].mxu1 %vm1636_vm9, %v3089_v28  ;;  %5324 = vmatmul.mubr.msk.f32.vlgmr.msra.gmra.mrb[30].mxu0 %vm1636_vm9, %v3170_v40  ;;  %v4068_v28 = vld [vmem:[%s7160_s9 + $0x10] sm:$0xff] }
 0x3ab   : > { %5677 = vmatpush3.bf16.msk.msra.mxu1 %vm6136_vm2, %v5675_v33  ;;  %5681 = vmatpush3.bf16.msk.msra.mxu0 %vm6136_vm2, %v5679_v34  ;;  %v3413_v44 = vpop.permute.xlu1 %3412  ;;  %v5718_v31 = vpack.c.bf16 %v4069_v29, %v4068_v28  ;;  %v5736_v33 = vpack.c.bf16 %v4155_v32, %v4154_v30  ;;  %v4070_v34 = vld [vmem:[%s7160_s9 + $0x20] sm:$0xff]  ;;  %v4072_v40 = vld [vmem:[%s7160_s9 + $0x30] sm:$0xff] }
 0x3ac   : > { %5330 = vmatprep.mubr.msk.f32.mxu1 %vm5949_vm6, %v5946_v7  ;;  %5337 = vmatprep.mubr.msk.f32.mxu0 %vm5949_vm6, %v5946_v7  ;;  %v5721_v37 = vpack.c.bf16 %v4071_v35, %v4070_v34 }
 0x3ad   : > { %v3332_v48 = vpop.permute.xlu0 %3331  ;;  %5682 = vmatprep.subr.bf16.mxu1 %v5948_v53  ;;  %5686 = vmatprep.subr.bf16.mxu0 %v5948_v53 }
 0x3ae   : > { %5331 = vmatmul.mubr.msk.f32.vlgmr.msra.gmra.mrb[36].mxu1 %vm1636_vm9, %v3251_v36  ;;  %5338 = vmatmul.mubr.msk.f32.vlgmr.msra.gmra.mrb[32].mxu0 %vm1636_vm9, %v3332_v48  ;;  %v4156_v36 = vld [vmem:[%s7161_s10 + $0x20] sm:$0xff] }
 0x3af   : > { %5685 = vmatpush3.bf16.msk.msra.mxu1 %vm6136_vm2, %v5683_v41  ;;  %5689 = vmatpush3.bf16.msk.msra.mxu0 %vm6136_vm2, %v5687_v42  ;;  %v3575_v56 = vpop.permute.xlu1 %3574  ;;  %v5739_v39 = vpack.c.bf16 %v4157_v38, %v4156_v36  ;;  %v4073_v41 = vld [vmem:[%s7160_s9 + $0x38] sm:$0xff]  ;;  %v4158_v42 = vld [vmem:[%s7161_s10 + $0x30] sm:$0xff]  ;;  %v4160_v48 = vld [vmem:[%s7161_s10 + $0x40] sm:$0xff] }
 0x3b0   : > { %5344 = vmatprep.mubr.msk.f32.mxu1 %vm5949_vm6, %v5946_v7  ;;  %5351 = vmatprep.mubr.msk.f32.mxu0 %vm5949_vm6, %v5946_v7  ;;  %v5724_v43 = vpack.c.bf16 %v4073_v41, %v4072_v40 }
 0x3b1   : > { %v3494_v57 = vpop.permute.xlu0 %3493  ;;  %5690 = vmatprep.subr.bf16.mxu1 %v5948_v53  ;;  %5694 = vmatprep.subr.bf16.mxu0 %v5948_v53 }
 0x3b2   : > { %5345 = vmatmul.mubr.msk.f32.vlgmr.msra.gmra.mrb[38].mxu1 %vm1636_vm9, %v3413_v44  ;;  %5352 = vmatmul.mubr.msk.f32.vlgmr.msra.gmra.mrb[34].mxu0 %vm1636_vm9, %v3494_v57  ;;  %v4159_v44 = vld [vmem:[%s7161_s10 + $0x38] sm:$0xff] }
 0x3b3   : > { %5693 = vmatpush3.bf16.msk.msra.mxu1 %vm6136_vm2, %v5691_v49  ;;  %5697 = vmatpush3.bf16.msk.msra.mxu0 %vm6136_vm2, %v5695_v50  ;;  %v3737_v1 = vpop.permute.xlu1 %3736  ;;  %v5742_v45 = vpack.c.bf16 %v4159_v44, %v4158_v42  ;;  %v5727_v49 = vpack.c.bf16 %v4075_v47, %v4074_v46  ;;  %v4161_v50 = vld [vmem:[%s7161_s10 + $0x48] sm:$0xff]  ;;  %v4163_v57 = vld [vmem:[%s7161_s10 + $0x58] sm:$0xff] }
 0x3b4   : > { %5358 = vmatprep.mubr.msk.f32.mxu1 %vm5949_vm6, %v5946_v7  ;;  %5365 = vmatprep.mubr.msk.f32.mxu0 %vm5949_vm6, %v5946_v7  ;;  %v5745_v51 = vpack.c.bf16 %v4161_v50, %v4160_v48 }
 0x3b5   : > { %v3656_v0 = vpop.permute.xlu0 %3655  ;;  %5698 = vmatprep.subr.bf16.mxu1 %v5948_v53  ;;  %5702 = vmatprep.subr.bf16.mxu0 %v5948_v53 }
 0x3b6   : > { %5359 = vmatmul.mubr.msk.f32.vlgmr.msra.gmra.mrb[40].mxu1 %vm1636_vm9, %v3575_v56  ;;  %5366 = vmatmul.mubr.msk.f32.vlgmr.msra.gmra.mrb[36].mxu0 %vm1636_vm9, %v3656_v0  ;;  %v5730_v56 = vpack.c.bf16 %v4077_v54, %v4076_v52 }
 0x3b7   : > { %5701 = vmatpush3.bf16.msk.msra.mxu1 %vm6136_vm2, %v5699_v58  ;;  %5705 = vmatpush3.bf16.msk.msra.mxu0 %vm6136_vm2, %v5703_v59  ;;  %v3899_v5 = vpop.permute.xlu1 %3898  ;;  %v5748_v58 = vpack.c.bf16 %v4163_v57, %v4162_v55 }
 0x3b8   : > { %5372 = vmatprep.mubr.msk.f32.mxu1 %vm5949_vm6, %v5946_v7  ;;  %5379 = vmatprep.mubr.msk.f32.mxu0 %vm5949_vm6, %v5946_v7 }
 0x3b9   : > { %v3818_v4 = vpop.permute.xlu0 %3817  ;;  %5706 = vmatprep.subr.bf16.mxu1 %v5948_v53  ;;  %5710 = vmatprep.subr.bf16.mxu0 %v5948_v53 }
 0x3ba   : > { %5373 = vmatmul.mubr.msk.f32.vlgmr.msra.gmra.mrb[42].mxu1 %vm1636_vm9, %v3737_v1  ;;  %5380 = vmatmul.mubr.msk.f32.vlgmr.msra.gmra.mrb[38].mxu0 %vm1636_vm9, %v3818_v4 }
 0x3bb   : > { %5709 = vmatpush3.bf16.msk.msra.mxu1 %vm6136_vm2, %v5707_v2  ;;  %5713 = vmatpush3.bf16.msk.msra.mxu0 %vm6136_vm2, %v5711_v3 }
 0x3bc   : > { %5386 = vmatprep.mubr.msk.f32.mxu1 %vm5949_vm6, %v5946_v7  ;;  %5393 = vmatprep.mubr.msk.f32.mxu0 %vm5949_vm6, %v5946_v7 }
 0x3bd   : > { %v3980_v6 = vpop.permute.xlu0 %3979  ;;  %5714 = vmatprep.subr.bf16.mxu1 %v5948_v53  ;;  %5732 = vmatprep.subr.bf16.mxu0 %v5948_v53 }
 0x3be   : > { %5387 = vmatmul.mubr.msk.f32.vlgmr.msra.gmra.mrb[44].mxu1 %vm1636_vm9, %v3899_v5  ;;  %5394 = vmatmul.mubr.msk.f32.vlgmr.msra.gmra.mrb[40].mxu0 %vm1636_vm9, %v3980_v6 }
 0x3bf   : > { %5420 = vmatprep.mubr.msk.f32.mxu1 %vm5949_vm6, %v5946_v7  ;;  %5447 = vmatprep.mubr.msk.f32.mxu0 %vm5949_vm6, %v5946_v7 }
 0x3c0   : > { %5716 = vmatpush3.bf16.msra.mxu1 %v5715_v25  ;;  %5734 = vmatpush3.bf16.msra.mxu0 %v5733_v27 }
 0x3c1   : > { %5717 = vmatprep.subr.bf16.mxu1 %v5948_v53  ;;  %5735 = vmatprep.subr.bf16.mxu0 %v5948_v53 }
 0x3c4   : > { %5719 = vmatpush3.bf16.msra.mxu1 %v5718_v31  ;;  %5737 = vmatpush3.bf16.msra.mxu0 %v5736_v33 }
 0x3c5   : > { %5720 = vmatprep.subr.bf16.mxu1 %v5948_v53  ;;  %5738 = vmatprep.subr.bf16.mxu0 %v5948_v53 }
 0x3c8   : > { %5722 = vmatpush3.bf16.msra.mxu1 %v5721_v37  ;;  %5740 = vmatpush3.bf16.msra.mxu0 %v5739_v39 }
 0x3c9   : > { %5723 = vmatprep.subr.bf16.mxu1 %v5948_v53  ;;  %5741 = vmatprep.subr.bf16.mxu0 %v5948_v53 }
 0x3cc   : > { %5725 = vmatpush3.bf16.msra.mxu1 %v5724_v43  ;;  %5743 = vmatpush3.bf16.msra.mxu0 %v5742_v45 }
 0x3cd   : > { %5726 = vmatprep.subr.bf16.mxu1 %v5948_v53  ;;  %5744 = vmatprep.subr.bf16.mxu0 %v5948_v53 }
 0x3d0   : > { %5728 = vmatpush3.bf16.msra.mxu1 %v5727_v49  ;;  %5746 = vmatpush3.bf16.msra.mxu0 %v5745_v51 }
 0x3d1   : > { %5729 = vmatprep.subr.bf16.mxu1 %v5948_v53  ;;  %5747 = vmatprep.subr.bf16.mxu0 %v5948_v53 }
 0x3d4   : > { %5731 = vmatpush3.bf16.msra.mxu1 %v5730_v56  ;;  %5749 = vmatpush3.bf16.msra.mxu0 %v5748_v58 }
 0x3d5   : > { %5450 = vmatprep.subr.mxu1 %v5946_v7  ;;  %5455 = vmatprep.subr.mxu0 %v5946_v7 }
 0x3ec   : > { %v1865_v8 = vpop.f32.mrb[18].mxu1 }
 0x3ed   : > { %v1709_v9 = vpop.f32.mrb[10].mxu0  ;;  %v5206_v11 = vpop.f32.mrb[19].mxu1 }
 0x3ee   : > { %v5192_v10 = vpop.f32.mrb[11].mxu0 }
 0x3f1   : > { %v2027_v12 = vpop.f32.mrb[20].mxu1  ;;  %v1785_v13 = vpop.f32.mrb[12].mxu0 }
 0x3f2   : > { %v5220_v14 = vpop.f32.mrb[21].mxu1  ;;  %v1786_v15 = vadd.f32 %v1785_v13, %v1709_v9  ;;  %v5199_v16 = vpop.f32.mrb[13].mxu0 }
 0x3f4   : > { %v1869_v17 = vadd.f32 %v1865_v8, %v1786_v15 }
 0x3f6   : > { %v1946_v18 = vpop.f32.mrb[14].mxu0 }
 0x3f7   : > { %v1950_v19 = vadd.f32 %v1946_v18, %v1869_v17  ;;  %v5213_v20 = vpop.f32.mrb[15].mxu0 }
 0x3f9   : > { %v2031_v21 = vadd.f32 %v2027_v12, %v1950_v19 }
 0x461   : > { %v2108_v59 = vpop.f32.mrb[16].mxu0 }
 0x462   : > { %v2112_v60 = vadd.f32 %v2108_v59, %v2031_v21  ;;  %v5227_v61 = vpop.f32.mrb[17].mxu0 }
 0x465   : > { %v2189_v62 = vpop.f32.mrb[22].mxu1  ;;  %v2270_v63 = vpop.f32.mrb[18].mxu0 }
 0x466   : > { %v2193_v0 = vadd.f32 %v2189_v62, %v2112_v60  ;;  %v5234_v1 = vpop.f32.mrb[23].mxu1  ;;  %v5241_v2 = vpop.f32.mrb[19].mxu0 }
 0x468   : > { %v2274_v3 = vadd.f32 %v2270_v63, %v2193_v0 }
 0x469   : > { %v2351_v4 = vpop.f32.mrb[24].mxu1  ;;  %v2432_v5 = vpop.f32.mrb[20].mxu0 }
 0x46a   : > { %v2355_v6 = vadd.f32 %v2351_v4, %v2274_v3  ;;  %v5248_v9 = vpop.f32.mrb[25].mxu1  ;;  %v5255_v8 = vpop.f32.mrb[21].mxu0 }
 0x46b   : > { %v5015_v9 = vld [vmem:[%s7213_s8] ss:$0 sm:$0xff] }
 0x46c   : > { %v2436_v10 = vadd.f32 %v2432_v5, %v2355_v6 }
 0x46d   : > { %v2513_v11 = vpop.f32.mrb[26].mxu1  ;;  %v2594_v12 = vpop.f32.mrb[22].mxu0 }
 0x46e   : > { %v2517_v13 = vadd.f32 %v2513_v11, %v2436_v10  ;;  %v5262_v14 = vpop.f32.mrb[27].mxu1  ;;  %v5269_v15 = vpop.f32.mrb[23].mxu0 }
 0x46f   : > { %v4385_v14 = vld [vmem:[%s7164_s13] sm:$0xff]  ;;  %v4387_v15 = vld [vmem:[%s7164_s13 + $0x10] sm:$0xff] }
 0x470   : > { %v2598_v16 = vadd.f32 %v2594_v12, %v2517_v13  ;;  %v4386_v12 = vld [vmem:[%s7164_s13 + $0x8] sm:$0xff]  ;;  %v4388_v13 = vld [vmem:[%s7164_s13 + $0x18] sm:$0xff] }
 0x471   : > { %v2675_v17 = vpop.f32.mrb[28].mxu1  ;;  %v2756_v18 = vpop.f32.mrb[24].mxu0 }
 0x472   : > { %v2679_v19 = vadd.f32 %v2675_v17, %v2598_v16  ;;  %v5276_v20 = vpop.f32.mrb[29].mxu1  ;;  %v5283_v21 = vpop.f32.mrb[25].mxu0 }
 0x473   : > { %v4392_v20 = vld [vmem:[%s7164_s13 + $0x38] sm:$0xff] }
 0x474   : > { %v2760_v22 = vadd.f32 %v2756_v18, %v2679_v19  ;;  %v4235_v18 = vld [vmem:[%s7162_s11] sm:$0xf]  ;;  %v4390_v19 = vld [vmem:[%s7164_s13 + $0x28] sm:$0xff] }
 0x475   : > { %v2837_v23 = vpop.f32.mrb[30].mxu1  ;;  %v2918_v24 = vpop.f32.mrb[26].mxu0 }
 0x476   : > { %v2841_v25 = vadd.f32 %v2837_v23, %v2760_v22  ;;  %v5290_v26 = vpop.f32.mrb[31].mxu1  ;;  %v5297_v27 = vpop.f32.mrb[27].mxu0 }
 0x477   : > { %v5752_v26 = vpack.c.bf16 %v4387_v15, %v4385_v14  ;;  %v5754_v27 = vpack.c.bf16 %v4392_v20, %v4390_v19  ;;  %v4519_v14 = vld [vmem:[%s7166_s15 + $0xb8] sm:$0xff] }
 0x478   : > { %v2922_v28 = vadd.f32 %v2918_v24, %v2841_v25  ;;  %v4310_v24 = vld [vmem:[%s7163_s12] sm:$0xf]  ;;  %v5750_v25 = vpack.c.bf16 %v4388_v13, %v4386_v12  ;;  %v4518_v12 = vld [vmem:[%s7166_s15 + $0xb0] sm:$0xff] }
 0x479   : > { %v2999_v29 = vpop.f32.mrb[32].mxu1  ;;  %v3080_v30 = vpop.f32.mrb[28].mxu0  ;;  %v5796_v15 = vpack.c.bf16 %v4519_v14, %v4518_v12 }
 0x47a   : > { %v3003_v31 = vadd.f32 %v2999_v29, %v2922_v28  ;;  %v5304_v32 = vpop.f32.mrb[33].mxu1  ;;  %v5311_v33 = vpop.f32.mrb[29].mxu0  ;;  %v4389_v28 = vld [vmem:[%s7164_s13 + $0x20] sm:$0xff]  ;;  %v4391_v29 = vld [vmem:[%s7164_s13 + $0x30] sm:$0xff] }
 0x47b   : > { %v5756_v32 = vpack.c.bf16 %v4391_v29, %v4389_v28 }
 0x47c   : > { %v3084_v34 = vadd.f32 %v3080_v30, %v3003_v31  ;;  %v4394_v30 = vld [vmem:[%s7164_s13 + $0x48] sm:$0xff]  ;;  %v4396_v31 = vld [vmem:[%s7164_s13 + $0x58] sm:$0xff] }
 0x47d   : > { %v3161_v35 = vpop.f32.mrb[34].mxu1  ;;  %v3242_v36 = vpop.f32.mrb[30].mxu0  ;;  %v5758_v33 = vpack.c.bf16 %v4396_v31, %v4394_v30 }
 0x47e   : > { %v3165_v37 = vadd.f32 %v3161_v35, %v3084_v34  ;;  %v5318_v38 = vpop.f32.mrb[35].mxu1  ;;  %v5325_v39 = vpop.f32.mrb[31].mxu0  ;;  %v4393_v34 = vld [vmem:[%s7164_s13 + $0x40] sm:$0xff]  ;;  %v4395_v35 = vld [vmem:[%s7164_s13 + $0x50] sm:$0xff] }
 0x47f   : > { %v4497_v38 = vld [vmem:[%s7166_s15 + $0x8] sm:$0xff]  ;;  %v4498_v39 = vld [vmem:[%s7166_s15 + $0x10] sm:$0xff] }
 0x480   : > { %v3246_v40 = vadd.f32 %v3242_v36, %v3165_v37  ;;  %v5760_v36 = vpack.c.bf16 %v4395_v35, %v4393_v34  ;;  %v4496_v37 = vld [vmem:[%s7166_s15] sm:$0xff] }
 0x481   : > { %v3323_v41 = vpop.f32.mrb[36].mxu1  ;;  %v3404_v42 = vpop.f32.mrb[32].mxu0 }
 0x482   : > { %v3327_v43 = vadd.f32 %v3323_v41, %v3246_v40  ;;  %v5332_v44 = vpop.f32.mrb[37].mxu1  ;;  %v5339_v45 = vpop.f32.mrb[33].mxu0  ;;  %v5763_v40 = vpack.c.bf16 %v4497_v38, %v4496_v37  ;;  %v4499_v41 = vld [vmem:[%s7166_s15 + $0x18] sm:$0xff] }
 0x483   : > { %v4501_v44 = vld [vmem:[%s7166_s15 + $0x28] sm:$0xff] }
 0x484   : > { %v3408_v46 = vadd.f32 %v3404_v42, %v3327_v43  ;;  %v5766_v42 = vpack.c.bf16 %v4499_v41, %v4498_v39  ;;  %v4500_v43 = vld [vmem:[%s7166_s15 + $0x20] sm:$0xff]  ;;  %v4598_v39 = vld [vmem:[%s7168_s17 + $0x10] sm:$0xff] }
 0x485   : > { %v3485_v47 = vpop.f32.mrb[38].mxu1  ;;  %v3566_v48 = vpop.f32.mrb[34].mxu0  ;;  %v5769_v45 = vpack.c.bf16 %v4501_v44, %v4500_v43  ;;  %v4676_v43 = vld [vmem:[%s7170_s19] sm:$0xff]  ;;  %v4677_v44 = vld [vmem:[%s7170_s19 + $0x8] sm:$0xff] }
 0x486   : > { %v3489_v49 = vadd.f32 %v3485_v47, %v3408_v46  ;;  %v5346_v50 = vpop.f32.mrb[39].mxu1  ;;  %v5353_v51 = vpop.f32.mrb[35].mxu0  ;;  %v4502_v46 = vld [vmem:[%s7166_s15 + $0x30] sm:$0xff]  ;;  %v4503_v47 = vld [vmem:[%s7166_s15 + $0x38] sm:$0xff] }
 0x487   : > { %v4505_v50 = vld [vmem:[%s7166_s15 + $0x48] sm:$0xff] }
 0x488   : > { %v3570_v52 = vadd.f32 %v3566_v48, %v3489_v49  ;;  %v5772_v48 = vpack.c.bf16 %v4503_v47, %v4502_v46  ;;  %v4504_v49 = vld [vmem:[%s7166_s15 + $0x40] sm:$0xff] }
 0x489   : > { %v3647_v54 = vpop.f32.mrb[40].mxu1  ;;  %v3728_v55 = vpop.f32.mrb[36].mxu0  ;;  %v5775_v51 = vpack.c.bf16 %v4505_v50, %v4504_v49  ;;  %v4678_v50 = vld [vmem:[%s7170_s19 + $0x10] sm:$0xff] }
 0x48a   : > { %v3651_v56 = vadd.f32 %v3647_v54, %v3570_v52  ;;  %v5360_v57 = vpop.f32.mrb[41].mxu1  ;;  %v5367_v58 = vpop.f32.mrb[37].mxu0  ;;  %v4506_v52 = vld [vmem:[%s7166_s15 + $0x50] sm:$0xff]  ;;  %v4507_v54 = vld [vmem:[%s7166_s15 + $0x58] sm:$0xff] }
 0x48b   : > { %v4509_v57 = vld [vmem:[%s7166_s15 + $0x68] sm:$0xff] }
 0x48c   : > { %v3732_v59 = vadd.f32 %v3728_v55, %v3651_v56  ;;  %v5778_v55 = vpack.c.bf16 %v4507_v54, %v4506_v52  ;;  %v4508_v56 = vld [vmem:[%s7166_s15 + $0x60] sm:$0xff] }
 0x48d   : > { %v3809_v60 = vpop.f32.mrb[42].mxu1  ;;  %v3890_v61 = vpop.f32.mrb[38].mxu0  ;;  %v5781_v58 = vpack.c.bf16 %v4509_v57, %v4508_v56  ;;  %v4600_v54 = vld [vmem:[%s7169_s18] sm:$0x1] }
 0x48e   : > { %v3813_v62 = vadd.f32 %v3809_v60, %v3732_v59  ;;  %v5374_v63 = vpop.f32.mrb[43].mxu1  ;;  %v5381_v0 = vpop.f32.mrb[39].mxu0 }
 0x48f   : > { %v4510_v0 = vld [vmem:[%s7166_s15 + $0x70] sm:$0xff] }
 0x490   : > { %v3894_v1 = vadd.f32 %v3890_v61, %v3813_v62 }
 0x491   : > { %v3971_v2 = vpop.f32.mrb[44].mxu1  ;;  %v4052_v3 = vpop.f32.mrb[40].mxu0 }
 0x492   : > { %v3975_v4 = vadd.f32 %v3971_v2, %v3894_v1  ;;  %v5388_v5 = vpop.f32.mrb[45].mxu1  ;;  %v5395_v6 = vpop.f32.mrb[41].mxu0  ;;  %v4511_v1 = vld [vmem:[%s7166_s15 + $0x78] sm:$0xff] }
 0x493   : > { %v5784_v2 = vpack.c.bf16 %v4511_v1, %v4510_v0  ;;  %v4514_v6 = vld [vmem:[%s7166_s15 + $0x90] sm:$0xff] }
 0x494   : > { %v4056_v8 = vadd.f32 %v4052_v3, %v3975_v4  ;;  %v4512_v3 = vld [vmem:[%s7166_s15 + $0x80] sm:$0xff]  ;;  %v4513_v4 = vld [vmem:[%s7166_s15 + $0x88] sm:$0xff] }
 0x495   : > { %v5787_v5 = vpack.c.bf16 %v4513_v4, %v4512_v3 }
 0x496   : > { %v4064_v10 = vadd.f32 %v5015_v9, %v4056_v8  ;;  %v4515_v9 = vld [vmem:[%s7166_s15 + $0x98] sm:$0xff] }
 0x497   : > { %v5790_v8 = vpack.c.bf16 %v4515_v9, %v4514_v6 }
 0x498   : > { %v4065_v11 = vmax.f32 %v4064_v10, 0.0  ;;  %v4516_v10 = vld [vmem:[%s7166_s15 + $0xa0] sm:$0xff] }
 0x49a   : > { %5421 = vmatmul.mubr.msk.f32.vlgmr.msra.gmra.mrb[46].mxu1 %vm4078_vm10, %v4065_v11  ;;  %5448 = vmatmul.mubr.msk.f32.vlgmr.msra.gmra.mrb[42].mxu0 %vm4078_vm10, %v4065_v11  ;;  %v4517_v11 = vld [vmem:[%s7166_s15 + $0xa8] sm:$0xff] }
 0x49b   : > { %5452 = vmatprep.mubr.msk.f32.mxu1 %vm5949_vm6, %v5946_v7  ;;  %5457 = vmatprep.mubr.msk.f32.mxu0 %vm5949_vm6, %v5946_v7  ;;  %v5793_v13 = vpack.c.bf16 %v4517_v11, %v4516_v10 }
 0x56d   : > { %v4148_v16 = vpop.f32.mrb[46].mxu1  ;;  %v4230_v17 = vpop.f32.mrb[42].mxu0 }
 0x56e   : > { %v4234_v21 = vmax.f32 %v4148_v16, %v4230_v17  ;;  %v5422_v22 = vpop.f32.mrb[47].mxu1  ;;  %v5449_v23 = vpop.f32.mrb[43].mxu0  ;;  %v4596_v16 = vld [vmem:[%s7168_s17] sm:$0xff]  ;;  %v4597_v17 = vld [vmem:[%s7168_s17 + $0x8] sm:$0xff] }
 0x570   : > { %5451 = vmatpush3.msra.mxu1 %v4234_v21  ;;  %5456 = vmatpush3.msra.mxu0 %v4234_v21  ;;  %v4472_v21 = vld [vmem:[%s7165_s14] sm:$0xff] }
 0x571   : > { %5453 = vmatmul.mubr.msk.f32.vlgmr.msra.gmra.mrb[48].mxu1 %vm4236_vm11, %v4235_v18  ;;  %5458 = vmatmul.mubr.msk.f32.vlgmr.msra.gmra.mrb[44].mxu0 %vm4236_vm11, %v4310_v24  ;;  %v5799_v18 = vpack.c.bf16 %v4597_v17, %v4596_v16 }
 0x572   : > { %5751 = vmatprep.subr.bf16.mxu1 %v5750_v25  ;;  %4465 = vmatprep.mubr.f32.mxu1 %v5946_v7 }
 0x573   : > { %5753 = vmatpush1.bf16.msra.mxu1 %v5752_v26  ;;  %5762 = vmatprep.subr.bf16.mxu0 %v5948_v53 }
 0x574   : > { %5755 = vmatprep.subr.bf16.mxu1 %v5754_v27  ;;  %5764 = vmatpush1.bf16.msra.mxu0 %v5763_v40  ;;  %v4599_v40 = vld [vmem:[%s7168_s17 + $0x18] sm:$0xff] }
 0x575   : > { %5765 = vmatprep.subr.bf16.mxu0 %v5948_v53  ;;  %v5802_v41 = vpack.c.bf16 %v4599_v40, %v4598_v39 }
 0x577   : > { %5757 = vmatpush1.bf16.msra.mxu1 %v5756_v32 }
 0x578   : > { %5759 = vmatprep.subr.bf16.mxu1 %v5758_v33  ;;  %5767 = vmatpush1.bf16.msra.mxu0 %v5766_v42  ;;  %v4520_v42 = vld [vmem:[%s7167_s16] sm:$0x1] }
 0x579   : > { %5768 = vmatprep.subr.bf16.mxu0 %v5948_v53 }
 0x57b   : > { %5761 = vmatpush1.bf16.msra.mxu1 %v5760_v36 }
 0x57c   : > { %5798 = vmatprep.subr.bf16.mxu1 %v5948_v53  ;;  %5770 = vmatpush1.bf16.msra.mxu0 %v5769_v45 }
 0x57d   : > { %5771 = vmatprep.subr.bf16.mxu0 %v5948_v53 }
 0x580   : > { %5773 = vmatpush1.bf16.msra.mxu0 %v5772_v48  ;;  %v5805_v48 = vpack.c.bf16 %v4677_v44, %v4676_v43 }
 0x581   : > { %5774 = vmatprep.subr.bf16.mxu0 %v5948_v53 }
 0x584   : > { %5776 = vmatpush1.bf16.msra.mxu0 %v5775_v51  ;;  %v4679_v51 = vld [vmem:[%s7170_s19 + $0x18] sm:$0xff] }
 0x585   : > { %5777 = vmatprep.subr.bf16.mxu0 %v5948_v53  ;;  %v5808_v52 = vpack.c.bf16 %v4679_v51, %v4678_v50 }
 0x588   : > { %5779 = vmatpush1.bf16.msra.mxu0 %v5778_v55 }
 0x589   : > { %5780 = vmatprep.subr.bf16.mxu0 %v5948_v53 }
 0x58c   : > { %5782 = vmatpush1.bf16.msra.mxu0 %v5781_v58 }
 0x58d   : > { %5783 = vmatprep.subr.bf16.mxu0 %v5948_v53 }
 0x590   : > { %5785 = vmatpush1.bf16.msra.mxu0 %v5784_v2 }
 0x591   : > { %5786 = vmatprep.subr.bf16.mxu0 %v5948_v53 }
 0x594   : > { %5788 = vmatpush1.bf16.msra.mxu0 %v5787_v5 }
 0x595   : > { %5789 = vmatprep.subr.bf16.mxu0 %v5948_v53 }
 0x598   : > { %5791 = vmatpush1.bf16.msra.mxu0 %v5790_v8 }
 0x599   : > { %5792 = vmatprep.subr.bf16.mxu0 %v5948_v53 }
 0x59c   : > { %5794 = vmatpush1.bf16.msra.mxu0 %v5793_v13 }
 0x59d   : > { %5795 = vmatprep.subr.bf16.mxu0 %v5948_v53 }
 0x5a0   : > { %5797 = vmatpush1.bf16.msra.mxu0 %v5796_v15 }
 0x644   : > { %v4306_v59 = vpop.f32.mrb[48].mxu1  ;;  %v4380_v60 = vpop.f32.mrb[44].mxu0 }
 0x645   : > { %v4384_v61 = vmax.f32 %v4306_v59, %v4380_v60  ;;  %v5454_v62 = vpop.f32.mrb[49].mxu1  ;;  %v5459_v63 = vpop.f32.mrb[45].mxu0 }
 0x647   : > { %5020 = vmatmul.mubr.msk.f32.vlgmr.msra.gmra.mrb[50].mxu1 %vm4397_vm12, %v4384_v61 }
 0x648   : > { %5468 = vmatprep.mubr.msk.f32.mxu1 %vm5949_vm6, %v5946_v7  ;;  %5800 = vmatpush3.bf16.msra.mxu1 %v5799_v18 }
 0x649   : > { %5801 = vmatprep.subr.bf16.mxu1 %v5948_v53 }
 0x64c   : > { %5803 = vmatpush3.bf16.msra.mxu1 %v5802_v41 }
 0x64d   : > { %5804 = vmatprep.subr.bf16.mxu1 %v5948_v53 }
 0x71a   : > { %v4467_v19 = vpop.f32.mrb[50].mxu1 }
 0x71b   : > { %v4469_v20 = vpop.f32.mrb[51].mxu1 }
 0x71c   : > { %v4475_v22 = vcombine.low %v4467_v19, %v4469_v20 }
 0x71e   : > { %v4477_v23 = vmul.f32 %v4475_v22, %v4472_v21 }
 0x720   : > { %v4479_v24 = vcombine.high %v4477_v23, %v4477_v23  ;;  %v4481_v25 = vsel %vm687_vm0, %v4477_v23, 0.0  ;;  %vm4754_vm0 = vcmask 73728  }
 0x721   : > { %v4482_v26 = vrot.slane %v4481_v25, 4 }
 0x722   : > { %v4489_v27 = vsel %vm4488_vm13, %v4479_v24, 0.0 }
 0x723   : > { %v4483_v28 = vadd.f32 %v4482_v26, %v4481_v25  ;;  %v4490_v29 = vrot.slane %v4489_v27, 4 }
 0x725   : > { %v4484_v30 = vrot.slane %v4483_v28, 2  ;;  %v4491_v31 = vadd.f32 %v4490_v29, %v4489_v27 }
 0x727   : > { %v4485_v32 = vadd.f32 %v4484_v30, %v4483_v28  ;;  %v4492_v33 = vrot.slane %v4491_v31, 2 }
 0x729   : > { %v4493_v34 = vadd.f32 %v4492_v33, %v4491_v31  ;;  %v4486_v35 = vrot.slane %v4485_v32, 1 }
 0x72b   : > { %v4494_v36 = vrot.slane %v4493_v34, 1  ;;  %v4487_v38 = vadd.f32 %v4486_v35, %v4485_v32 }
 0x72d   : > { %v4495_v37 = vadd.f32 %v4494_v36, %v4493_v34 }
 0x72f   : > { %5021 = vmatprep.mubr.msk.f32.mxu0 %vm4521_vm14, %v4495_v37 }
 0x730   : > { %4590 = vmatmul.mubr.f32.vlgmr.msra.gmra.mrb[46].mxu0 %v4487_v38 }
 0x803   : > { %v4591_v45 = vpop.f32.mrb[46].mxu0 }
 0x804   : > { %v4592_v46 = vadd.f32 %v4591_v45, %v4520_v42  ;;  %v4593_v47 = vpop.f32.mrb[47].mxu0 }
 0x806   : > { %v4595_v49 = vmax.f32 %v4592_v46, 0.0 }
 0x808   : > { %5469 = vmatmul.mubr.msk.f32.vlgmr.msra.gmra.mrb[52].mxu1 %vm4601_vm15, %v4595_v49 }
 0x809   : > { %5806 = vmatpush3.bf16.msra.mxu1 %v5805_v48  ;;  %5479 = vmatprep.mubr.msk.f32.mxu1 %vm5949_vm6, %v5946_v7 }
 0x80a   : > { %5807 = vmatprep.subr.bf16.mxu1 %v5948_v53  ;;  %v4680_v53 = vld [vmem:[%s7214_s0] sm:$0x1]  ;;  %s5886_s0 = sshll.u32 %s5955_s3, 4  ;;  %s5887_s0 = int_to_ptr.vmem [resolvable:$false] %s5886_s0 }
 0x80b   : > { %s5888_s8 = scalar_lea.vmem %s5887_s0, 32  ;;  %p5889_p0 = scmp.lt.s32.totalorder %s7111_s1, %s5887_s0 }
 0x80c   : > { %p5890_p1 = scmp.lt.s32.totalorder %s5888_s8, %s5882_s4 }
 0x80d   : > { %5809 = vmatpush3.bf16.msra.mxu1 %v5808_v52 }
 0x80e   : > { %p5891_p2 = por %p5890_p1, %p5889_p0 }
 0x810   : > { %p5892_p3 = pnand %p5891_p2, %p5885_p13 }
 0x8db   : > { %v4671_v55 = vpop.f32.mrb[52].mxu1 }
 0x8dc   : > { %v4672_v56 = vadd.f32 %v4671_v55, %v4600_v54  ;;  %v5470_v57 = vpop.f32.mrb[53].mxu1 }
 0x8de   : > { %v4675_v7 = vmax.f32 %v4672_v56, 0.0 }
 0x8e0   : > { %5480 = vmatmul.mubr.msk.f32.vlgmr.msra.gmra.mrb[54].mxu1 %vm4601_vm15, %v4675_v7 }
 0x9b3   : > { %v4750_v58 = vpop.f32.mrb[54].mxu1 }
 0x9b4   : > { %v4751_v59 = vadd.f32 %v4750_v58, %v4680_v53  ;;  %v5481_v60 = vpop.f32.mrb[55].mxu1 }
 0x9b6   : > { %4755 = vst.msk [vmem:[%s648_s27] sm:$0x1] %vm4754_vm0, %v4751_v59 }
 0x9b7   : > { %5895 = shalt.err (!%p5892_p3)
}
 0x9b8   : > { %s5896_s20 = scalar_lea.hbm %s7109_s7, 16  ;;  %s5900_s28 = scalar_lea.hbm %s7216_s6, 32 }
 0x9b9   : > { %p5897_p4 = scmp.ne.s32.totalorder %s7109_s7, %s5896_s20  ;;  %p5901_p9 = scmp.lt.u32.totalorder %s7109_s7, %s7216_s6 }
 0x9ba   : > { %p5902_p10 = scmp.lt.u32.totalorder %s5900_s28, %s5896_s20  ;;  %p5904_p12 = scmp.lt.u32.totalorder %s5896_s20, %s7109_s7 }
 0x9bb   : > { %p5898_p7 = pnand %p5897_p4, %p6104_p5 }
 0x9bc   : > { %p5903_p11 = por %p5902_p10, %p5901_p9 }
 0x9bd   : > { %p5899_p8 = pneg %p5898_p7 }
 0x9be   : > { %p5905_p13 = por %p5904_p12, %p5903_p11 }
 0x9c0   : > { %p5906_p0 = pnand %p5905_p13, %p5899_p8 }
 0x9c2   : > { %5909 = shalt.err (!%p5906_p0)
}
 0x9c3   : > { %5834 = dma.vmem_to_hbm [thread:$0]  (%p6104_p5), %s7111_s1, 16, %s7109_s7, %s4757_s30  }
 0x9c4 PF: > { %s7217_s8 = sld [smem:[#allocation8_spill]]  ;;  %s7218_s4 = sld [smem:[#allocation6_spill]] }
 0x9ca   : > { %p5840_p1 = scmp.ge.s32.totalorder %s7217_s8, 2  ;;  %s4781_s0 = sand.u32 1, %s7218_s4  }
 0x9cb   : > { %s4782_s22 = scalar_lea.sflag [#allocation4], %s4781_s0 }
 0x9cc   : > { %p5837_p2 = pnand %p5840_p1, %p6108_p6 }
 0x9ce   : > { %5927 = dma.done.wait (!%p5837_p2), %s4782_s22, 16  }
 0x9cf   : > { %5929 = vsyncadd (!%p5837_p2), %s4782_s22, 4294967280  ;;  %s7220_s27 = sld [smem:[#allocation9_spill]]  ;;  %s7221_s20 = sld [smem:[#allocation7_spill]] }
 0x9d0   : > { %s7222_s26 = sld [smem:[#allocation10_spill]]  ;;  %s7223_s2 = smov %s5936_s25 }
 0x9d5   : > { %p31_p3 = scmp.ge.s32.totalorder %s7220_s27, 4   ;;  %s7224_s25 = smov %s7221_s20 }
 0x9d7   :  { %33 = sbr.rel (!%p31_p3) target bundleno = 15 (0xf), region = 172 }
 0x9de   :  { %4786 = vsyncpa [#allocation4], 1 }
 0x9df   :  { %4788 = vsyncpa [#allocation4 + $0x1], 1 }

</bundles_post_ra>
